<compile_context>
chip_gen: v6e
topology: v6e:2x2x1
jax: 0.10.0
libtpu: 0.0.40
codegen_flags: <defaults>
</compile_context>

<pallas_src>
import functools

import jax
import jax.numpy as jnp
from jax.experimental import pallas as pl
from jax.experimental.pallas import tpu as pltpu


# ------------------------------------------------------------------ #
# Fused kernel: L skew-pipelined LSTM layers + Linear->ReLU->Linear.  #
# Kernel-side gate order along the 4H axis is (i, f, o, g).           #
# ------------------------------------------------------------------ #
def _fused_lstm_mlp_kernel(num_layers, hidden, seq_len, batch, x_ref, *refs):
    # refs layout:
    #   wx0 (I,4H), wh0 (H,4H), b0 (1,4H),                 layer 0
    #   [wxh_l (2H,4H), b_l (1,4H)] for l = 1..L-1,        deeper layers
    #   w1 (H,H), b1 (1,H), w2 (H,O), b2 (1,O),            MLP head
    #   out_ref (B,O)
    L, H, T, B = num_layers, hidden, seq_len, batch
    f32 = jnp.float32

    wx0_ref, wh0_ref, b0_ref = refs[0:3]
    pos = 3
    deep = []
    for _ in range(1, L):
        deep.append((refs[pos], refs[pos + 1]))
        pos += 2
    w1_ref, b1_ref, w2_ref, b2_ref = refs[pos:pos + 4]
    out_ref = refs[pos + 4]

    wh0 = wh0_ref[...]                                     # (H, 4H) bf16
    wdtype = wh0.dtype
    wxh = [r[...] for (r, _) in deep]                      # (2H, 4H) bf16
    # Hoisted bias broadcasts (JAX does not CSE broadcast_in_dim).
    b_bcast = [jnp.broadcast_to(br[...], (B, 4 * H)) for (_, br) in deep]

    # --- Hoisted non-recurrent input projection for layer 0 (bias folded) ---
    # One (T*B, I) @ (I, 4H) MXU push covering every timestep at once.
    xproj0 = (jnp.dot(x_ref[...], wx0_ref[...], preferred_element_type=f32)
              + b0_ref[...]).reshape(T, B, 4 * H)          # (T, B, 4H) f32

    def gates(pre, c):
        # (i, f, o, g): one sigmoid over contiguous 3H lanes, one tanh over H.
        sig = jax.nn.sigmoid(pre[:, 0:3 * H])
        g_g = jnp.tanh(pre[:, 3 * H:4 * H])
        i_g = sig[:, 0:H]
        f_g = sig[:, H:2 * H]
        o_g = sig[:, 2 * H:3 * H]
        c_new = f_g * c + i_g * g_g
        h_new = o_g * jnp.tanh(c_new)                      # f32
        return h_new, c_new

    # Per-layer state: h carried in bf16 (matmul operand), c in f32.
    h = [jnp.zeros((B, H), wdtype) for _ in range(L)]
    c = [jnp.zeros((B, H), f32) for _ in range(L)]
    x_in = [None] * L    # x_in[l] (l>=1): layer l-1's output, one-step skewed.

    # Skewed software pipeline: at outer iteration t, layer l processes time
    # s = t - l.  Every active layer step depends only on state carried from
    # iteration t-1, so the L dependency chains overlap within an iteration.
    # Fully unrolled (T + L - 1 iterations, all shapes static).
    for t in range(T + L - 1):
        new_h, new_c, new_x_in = list(h), list(c), list(x_in)
        for l in range(L):
            s = t - l
            if not (0 <= s < T):
                continue
            if l == 0:
                pre = xproj0[s] + jnp.dot(h[0], wh0,
                                          preferred_element_type=f32)
            else:
                hx = jnp.concatenate([x_in[l], h[l]], axis=-1)   # (B, 2H) bf16
                pre = (jnp.dot(hx, wxh[l - 1], preferred_element_type=f32)
                       + b_bcast[l - 1])
            h_f32, c_new = gates(pre, c[l])
            h_new = h_f32.astype(wdtype)                   # cast once, reuse
            new_h[l], new_c[l] = h_new, c_new
            if l + 1 < L:
                new_x_in[l + 1] = h_new
        h, c, x_in = new_h, new_c, new_x_in

    # MLP head on the last layer's final hidden state (== output[:, -1, :]).
    hid = jnp.maximum(
        jnp.dot(h[L - 1], w1_ref[...], preferred_element_type=f32)
        + b1_ref[...], 0.0)
    out = (jnp.dot(hid.astype(w2_ref.dtype), w2_ref[...],
                   preferred_element_type=f32)
           + b2_ref[...])
    out_ref[...] = out.astype(out_ref.dtype)


def _vmem_limit_bytes(T, B, I, H, L, O):
    bf16, f32 = 2, 4
    w = (I + H) * 4 * H * bf16 + 4 * H * f32               # layer 0
    w += (L - 1) * (2 * H * 4 * H * bf16 + 4 * H * f32)    # deeper layers
    w += (H * H + H * O) * bf16 + (H + O) * f32            # MLP head
    act = T * B * I * bf16 + T * B * 4 * H * f32 + B * O * f32
    est = 2 * (w + act) + (1 << 20)                        # headroom + slack
    try:
        cap = pltpu.get_tpu_info().vmem_capacity_bytes     # 64 MiB/TC on v7x
    except Exception:
        cap = 64 << 20
    return int(min(max(est, 16 << 20), cap // 2))


# ------------------------------------------------------------------ #
# Full TorchLSTM.forward equivalent (single pallas_call, no grid).    #
# ------------------------------------------------------------------ #
def torch_lstm_forward(x_bf, lstm_params, mlp_params):
    """x_bf: (B, T, I) batch_first, like PyTorch.  Returns (B, O) f32."""
    B, T, I = x_bf.shape
    L = len(lstm_params)
    H = lstm_params[0][1].shape[0]           # wh: (H, 4H)
    w1, b1, w2, b2 = mlp_params
    O = w2.shape[-1]

    # Time-major, flattened (T*B, I) bf16 input (tiny one-off XLA op).
    x2d = jnp.transpose(x_bf, (1, 0, 2)).reshape(T * B, I).astype(jnp.bfloat16)

    def repack(w):   # PyTorch gate columns (i,f,g,o) -> kernel order (i,f,o,g)
        return jnp.concatenate(
            [w[..., 0:H], w[..., H:2 * H], w[..., 3 * H:4 * H],
             w[..., 2 * H:3 * H]], axis=-1)

    flat = []
    for layer, (wx, wh, b) in enumerate(lstm_params):
        wx_r = repack(wx).astype(jnp.bfloat16)
        wh_r = repack(wh).astype(jnp.bfloat16)
        b_r = repack(b).astype(jnp.float32)
        if layer == 0:
            flat += [wx_r, wh_r, b_r]
        else:
            # Stack [wx; wh] so x-path and h-path share one MXU push per step.
            flat += [jnp.concatenate([wx_r, wh_r], axis=0), b_r]
    flat += [w1.astype(jnp.bfloat16), b1.astype(jnp.float32),
             w2.astype(jnp.bfloat16), b2.astype(jnp.float32)]

    kernel = functools.partial(_fused_lstm_mlp_kernel, L, H, T, B)

    # No grid: whole (tiny) arrays live single-buffered in VMEM, one launch.
    return pl.pallas_call(
        kernel,
        out_shape=jax.ShapeDtypeStruct((B, O), jnp.float32),
        compiler_params=pltpu.CompilerParams(
            vmem_limit_bytes=_vmem_limit_bytes(T, B, I, H, L, O)),
    )(x2d, *flat)


# ------------------------------------------------------------------ #
# Pure-JAX reference (f32) for a correctness check.                   #
# ------------------------------------------------------------------ #
def reference_forward(x_bf, lstm_params, mlp_params):
    seq = jnp.transpose(x_bf, (1, 0, 2))     # (T, B, I)
    B = seq.shape[1]
    for (wx, wh, b) in lstm_params:          # gate order (i,f,g,o)
        H = wh.shape[0]

        def step(carry, x_t):
            h, c = carry
            pre = x_t @ wx + h @ wh + b
            i = jax.nn.sigmoid(pre[:, 0:H])
            f = jax.nn.sigmoid(pre[:, H:2 * H])
            g = jnp.tanh(pre[:, 2 * H:3 * H])
            o = jax.nn.sigmoid(pre[:, 3 * H:4 * H])
            c = f * c + i * g
            h = o * jnp.tanh(c)
            return (h, c), h

        init = (jnp.zeros((B, H), jnp.float32), jnp.zeros((B, H), jnp.float32))
        _, hs = jax.lax.scan(step, init, seq)
        seq = hs
    w1, b1, w2, b2 = mlp_params
    hid = jnp.maximum(seq[-1] @ w1 + b1, 0.0)
    return hid @ w2 + b2


# ------------------------------------------------------------------ #
# Deterministic parameter construction (PyTorch-style uniform init),  #
# stored in the fused-gate (in,4H)/(H,4H) layout, gate order (i,f,g,o)#
# ------------------------------------------------------------------ #
def make_params(key, size_input, size_hidden, num_layers, size_output):
    def uni(k, shape, bound):
        return jax.random.uniform(k, shape, jnp.float32, -bound, bound)

    H = size_hidden
    bound = 1.0 / float(H) ** 0.5
    lstm_params = []
    for layer in range(num_layers):
        in_dim = size_input if layer == 0 else H
        key, k1, k2, k3, k4 = jax.random.split(key, 5)
        w_ih = uni(k1, (4 * H, in_dim), bound)   # PyTorch layout, gates (i,f,g,o)
        w_hh = uni(k2, (4 * H, H), bound)
        b_ih = uni(k3, (4 * H,), bound)
        b_hh = uni(k4, (4 * H,), bound)
        wx = w_ih.T                              # (in, 4H) fused-gate layout
        wh = w_hh.T                              # (H, 4H)
        b = (b_ih + b_hh).reshape(1, 4 * H)      # (1, 4H)
        lstm_params.append((wx, wh, b))

    key, k1, k2, k3, k4 = jax.random.split(key, 5)
    w1 = uni(k1, (H, H), bound)
    b1 = uni(k2, (1, H), bound)
    w2 = uni(k3, (H, size_output), bound)
    b2 = uni(k4, (1, size_output), bound)
    return lstm_params, (w1, b1, w2, b2)


if __name__ == "__main__":
    # Small shapes consistent with the module's forward:
    B, T, I, H, L, O = 2, 8, 4, 32, 2, 24   # batch, seq_length, size_input,
                                            # size_hidden, num_layers_lstm, output
    key = jax.random.PRNGKey(0)
    key, kx = jax.random.split(key)
    x = jax.random.normal(kx, (B, T, I), jnp.float32)   # batch_first input

    lstm_params, mlp_params = make_params(key, I, H, L, O)

    out = torch_lstm_forward(x, lstm_params, mlp_params)
    out = jax.block_until_ready(out)
    assert out.shape == (B, O)

    ref = reference_forward(x, lstm_params, mlp_params)
    max_err = float(jnp.max(jnp.abs(out - ref)))
    assert max_err < 0.1, f"mismatch vs reference, max_err={max_err}"
    print("KERNEL_OK")
</pallas_src>

<mosaic_0001>
module attributes {stable_mosaic.version = 11 : i64} {
  func.func @_fused_lstm_mlp_kernel(%arg0: memref<16x4xbf16, #tpu.memory_space<vmem>>, %arg1: memref<4x128xbf16, #tpu.memory_space<vmem>>, %arg2: memref<32x128xbf16, #tpu.memory_space<vmem>>, %arg3: memref<1x128xf32, #tpu.memory_space<vmem>>, %arg4: memref<64x128xbf16, #tpu.memory_space<vmem>>, %arg5: memref<1x128xf32, #tpu.memory_space<vmem>>, %arg6: memref<32x32xbf16, #tpu.memory_space<vmem>>, %arg7: memref<1x32xf32, #tpu.memory_space<vmem>>, %arg8: memref<32x24xbf16, #tpu.memory_space<vmem>>, %arg9: memref<1x24xf32, #tpu.memory_space<vmem>>, %arg10: memref<2x24xf32, #tpu.memory_space<vmem>>) attributes {dimension_semantics = [], scalar_prefetch = 0 : i64, scratch_operands = 0 : i64, tpu.core_type = #tpu.core_type<tc>} {
    %c0 = arith.constant 0 : index
    %c0_0 = arith.constant 0 : index
    %0 = vector.load %arg2[%c0, %c0_0] : memref<32x128xbf16, #tpu.memory_space<vmem>>, vector<32x128xbf16>
    %c0_1 = arith.constant 0 : index
    %c0_2 = arith.constant 0 : index
    %1 = vector.load %arg4[%c0_1, %c0_2] : memref<64x128xbf16, #tpu.memory_space<vmem>>, vector<64x128xbf16>
    %c0_3 = arith.constant 0 : index
    %c0_4 = arith.constant 0 : index
    %2 = vector.load %arg5[%c0_3, %c0_4] : memref<1x128xf32, #tpu.memory_space<vmem>>, vector<1x128xf32>
    %3 = vector.shape_cast %2 : vector<1x128xf32> to vector<1x128xf32>
    %4 = vector.broadcast %3 : vector<1x128xf32> to vector<2x128xf32>
    %c0_5 = arith.constant 0 : index
    %c0_6 = arith.constant 0 : index
    %5 = vector.load %arg0[%c0_5, %c0_6] : memref<16x4xbf16, #tpu.memory_space<vmem>>, vector<16x4xbf16>
    %c0_7 = arith.constant 0 : index
    %c0_8 = arith.constant 0 : index
    %6 = vector.load %arg1[%c0_7, %c0_8] : memref<4x128xbf16, #tpu.memory_space<vmem>>, vector<4x128xbf16>
    %cst = arith.constant dense<0.000000e+00> : vector<16x128xf32>
    %7 = tpu.matmul %5, %6, %cst {dimension_numbers = #tpu.dot_dimension_numbers<[1], [0], [0], [1], [0, 0, 1, 1], [], []>} : vector<16x4xbf16>, vector<4x128xbf16>, vector<16x128xf32> -> vector<16x128xf32>
    %c0_9 = arith.constant 0 : index
    %c0_10 = arith.constant 0 : index
    %8 = vector.load %arg3[%c0_9, %c0_10] : memref<1x128xf32, #tpu.memory_space<vmem>>, vector<1x128xf32>
    %9 = vector.broadcast %8 : vector<1x128xf32> to vector<16x128xf32>
    %10 = arith.addf %7, %9 : vector<16x128xf32>
    %11 = vector.shape_cast %10 : vector<16x128xf32> to vector<8x2x128xf32>
    %cst_11 = arith.constant 0.000000e+00 : bf16
    %12 = vector.broadcast %cst_11 : bf16 to vector<2x32xbf16>
    %cst_12 = arith.constant 0.000000e+00 : bf16
    %13 = vector.broadcast %cst_12 : bf16 to vector<2x32xbf16>
    %cst_13 = arith.constant 0.000000e+00 : f32
    %14 = vector.broadcast %cst_13 : f32 to vector<2x32xf32>
    %cst_14 = arith.constant 0.000000e+00 : f32
    %15 = vector.broadcast %cst_14 : f32 to vector<2x32xf32>
    %16 = vector.extract_strided_slice %11 {offsets = [0, 0, 0], sizes = [1, 2, 128], strides = [1, 1, 1]} : vector<8x2x128xf32> to vector<1x2x128xf32>
    %17 = vector.shape_cast %16 : vector<1x2x128xf32> to vector<2x128xf32>
    %cst_15 = arith.constant dense<0.000000e+00> : vector<2x128xf32>
    %18 = tpu.matmul %12, %0, %cst_15 {dimension_numbers = #tpu.dot_dimension_numbers<[1], [0], [0], [1], [0, 0, 1, 1], [], []>} : vector<2x32xbf16>, vector<32x128xbf16>, vector<2x128xf32> -> vector<2x128xf32>
    %19 = arith.addf %17, %18 : vector<2x128xf32>
    %20 = vector.extract_strided_slice %19 {offsets = [0, 0], sizes = [2, 96], strides = [1, 1]} : vector<2x128xf32> to vector<2x96xf32>
    %21 = arith.negf %20 : vector<2x96xf32>
    %22 = math.exp %21 : vector<2x96xf32>
    %cst_16 = arith.constant 1.000000e+00 : f32
    %23 = vector.broadcast %cst_16 : f32 to vector<2x96xf32>
    %24 = arith.addf %23, %22 : vector<2x96xf32>
    %25 = arith.divf %23, %24 : vector<2x96xf32>
    %26 = vector.extract_strided_slice %19 {offsets = [0, 96], sizes = [2, 32], strides = [1, 1]} : vector<2x128xf32> to vector<2x32xf32>
    %27 = math.tanh %26 : vector<2x32xf32>
    %28 = vector.extract_strided_slice %25 {offsets = [0, 0], sizes = [2, 32], strides = [1, 1]} : vector<2x96xf32> to vector<2x32xf32>
    %29 = vector.extract_strided_slice %25 {offsets = [0, 32], sizes = [2, 32], strides = [1, 1]} : vector<2x96xf32> to vector<2x32xf32>
    %30 = vector.extract_strided_slice %25 {offsets = [0, 64], sizes = [2, 32], strides = [1, 1]} : vector<2x96xf32> to vector<2x32xf32>
    %31 = arith.mulf %29, %14 : vector<2x32xf32>
    %32 = arith.mulf %28, %27 : vector<2x32xf32>
    %33 = arith.addf %31, %32 : vector<2x32xf32>
    %34 = math.tanh %33 : vector<2x32xf32>
    %35 = arith.mulf %30, %34 : vector<2x32xf32>
    %36 = arith.truncf %35 : vector<2x32xf32> to vector<2x32xbf16>
    %37 = vector.extract_strided_slice %11 {offsets = [1, 0, 0], sizes = [1, 2, 128], strides = [1, 1, 1]} : vector<8x2x128xf32> to vector<1x2x128xf32>
    %38 = vector.shape_cast %37 : vector<1x2x128xf32> to vector<2x128xf32>
    %cst_17 = arith.constant dense<0.000000e+00> : vector<2x128xf32>
    %39 = tpu.matmul %36, %0, %cst_17 {dimension_numbers = #tpu.dot_dimension_numbers<[1], [0], [0], [1], [0, 0, 1, 1], [], []>} : vector<2x32xbf16>, vector<32x128xbf16>, vector<2x128xf32> -> vector<2x128xf32>
    %40 = arith.addf %38, %39 : vector<2x128xf32>
    %41 = vector.extract_strided_slice %40 {offsets = [0, 0], sizes = [2, 96], strides = [1, 1]} : vector<2x128xf32> to vector<2x96xf32>
    %42 = arith.negf %41 : vector<2x96xf32>
    %43 = math.exp %42 : vector<2x96xf32>
    %cst_18 = arith.constant 1.000000e+00 : f32
    %44 = vector.broadcast %cst_18 : f32 to vector<2x96xf32>
    %45 = arith.addf %44, %43 : vector<2x96xf32>
    %46 = arith.divf %44, %45 : vector<2x96xf32>
    %47 = vector.extract_strided_slice %40 {offsets = [0, 96], sizes = [2, 32], strides = [1, 1]} : vector<2x128xf32> to vector<2x32xf32>
    %48 = math.tanh %47 : vector<2x32xf32>
    %49 = vector.extract_strided_slice %46 {offsets = [0, 0], sizes = [2, 32], strides = [1, 1]} : vector<2x96xf32> to vector<2x32xf32>
    %50 = vector.extract_strided_slice %46 {offsets = [0, 32], sizes = [2, 32], strides = [1, 1]} : vector<2x96xf32> to vector<2x32xf32>
    %51 = vector.extract_strided_slice %46 {offsets = [0, 64], sizes = [2, 32], strides = [1, 1]} : vector<2x96xf32> to vector<2x32xf32>
    %52 = arith.mulf %50, %33 : vector<2x32xf32>
    %53 = arith.mulf %49, %48 : vector<2x32xf32>
    %54 = arith.addf %52, %53 : vector<2x32xf32>
    %55 = math.tanh %54 : vector<2x32xf32>
    %56 = arith.mulf %51, %55 : vector<2x32xf32>
    %57 = arith.truncf %56 : vector<2x32xf32> to vector<2x32xbf16>
    %58 = tpu.concatenate %36, %13 in 1 : vector<2x32xbf16>, vector<2x32xbf16> -> vector<2x64xbf16>
    %cst_19 = arith.constant dense<0.000000e+00> : vector<2x128xf32>
    %59 = tpu.matmul %58, %1, %cst_19 {dimension_numbers = #tpu.dot_dimension_numbers<[1], [0], [0], [1], [0, 0, 1, 1], [], []>} : vector<2x64xbf16>, vector<64x128xbf16>, vector<2x128xf32> -> vector<2x128xf32>
    %60 = arith.addf %59, %4 : vector<2x128xf32>
    %61 = vector.extract_strided_slice %60 {offsets = [0, 0], sizes = [2, 96], strides = [1, 1]} : vector<2x128xf32> to vector<2x96xf32>
    %62 = arith.negf %61 : vector<2x96xf32>
    %63 = math.exp %62 : vector<2x96xf32>
    %cst_20 = arith.constant 1.000000e+00 : f32
    %64 = vector.broadcast %cst_20 : f32 to vector<2x96xf32>
    %65 = arith.addf %64, %63 : vector<2x96xf32>
    %66 = arith.divf %64, %65 : vector<2x96xf32>
    %67 = vector.extract_strided_slice %60 {offsets = [0, 96], sizes = [2, 32], strides = [1, 1]} : vector<2x128xf32> to vector<2x32xf32>
    %68 = math.tanh %67 : vector<2x32xf32>
    %69 = vector.extract_strided_slice %66 {offsets = [0, 0], sizes = [2, 32], strides = [1, 1]} : vector<2x96xf32> to vector<2x32xf32>
    %70 = vector.extract_strided_slice %66 {offsets = [0, 32], sizes = [2, 32], strides = [1, 1]} : vector<2x96xf32> to vector<2x32xf32>
    %71 = vector.extract_strided_slice %66 {offsets = [0, 64], sizes = [2, 32], strides = [1, 1]} : vector<2x96xf32> to vector<2x32xf32>
    %72 = arith.mulf %70, %15 : vector<2x32xf32>
    %73 = arith.mulf %69, %68 : vector<2x32xf32>
    %74 = arith.addf %72, %73 : vector<2x32xf32>
    %75 = math.tanh %74 : vector<2x32xf32>
    %76 = arith.mulf %71, %75 : vector<2x32xf32>
    %77 = arith.truncf %76 : vector<2x32xf32> to vector<2x32xbf16>
    %78 = vector.extract_strided_slice %11 {offsets = [2, 0, 0], sizes = [1, 2, 128], strides = [1, 1, 1]} : vector<8x2x128xf32> to vector<1x2x128xf32>
    %79 = vector.shape_cast %78 : vector<1x2x128xf32> to vector<2x128xf32>
    %cst_21 = arith.constant dense<0.000000e+00> : vector<2x128xf32>
    %80 = tpu.matmul %57, %0, %cst_21 {dimension_numbers = #tpu.dot_dimension_numbers<[1], [0], [0], [1], [0, 0, 1, 1], [], []>} : vector<2x32xbf16>, vector<32x128xbf16>, vector<2x128xf32> -> vector<2x128xf32>
    %81 = arith.addf %79, %80 : vector<2x128xf32>
    %82 = vector.extract_strided_slice %81 {offsets = [0, 0], sizes = [2, 96], strides = [1, 1]} : vector<2x128xf32> to vector<2x96xf32>
    %83 = arith.negf %82 : vector<2x96xf32>
    %84 = math.exp %83 : vector<2x96xf32>
    %cst_22 = arith.constant 1.000000e+00 : f32
    %85 = vector.broadcast %cst_22 : f32 to vector<2x96xf32>
    %86 = arith.addf %85, %84 : vector<2x96xf32>
    %87 = arith.divf %85, %86 : vector<2x96xf32>
    %88 = vector.extract_strided_slice %81 {offsets = [0, 96], sizes = [2, 32], strides = [1, 1]} : vector<2x128xf32> to vector<2x32xf32>
    %89 = math.tanh %88 : vector<2x32xf32>
    %90 = vector.extract_strided_slice %87 {offsets = [0, 0], sizes = [2, 32], strides = [1, 1]} : vector<2x96xf32> to vector<2x32xf32>
    %91 = vector.extract_strided_slice %87 {offsets = [0, 32], sizes = [2, 32], strides = [1, 1]} : vector<2x96xf32> to vector<2x32xf32>
    %92 = vector.extract_strided_slice %87 {offsets = [0, 64], sizes = [2, 32], strides = [1, 1]} : vector<2x96xf32> to vector<2x32xf32>
    %93 = arith.mulf %91, %54 : vector<2x32xf32>
    %94 = arith.mulf %90, %89 : vector<2x32xf32>
    %95 = arith.addf %93, %94 : vector<2x32xf32>
    %96 = math.tanh %95 : vector<2x32xf32>
    %97 = arith.mulf %92, %96 : vector<2x32xf32>
    %98 = arith.truncf %97 : vector<2x32xf32> to vector<2x32xbf16>
    %99 = tpu.concatenate %57, %77 in 1 : vector<2x32xbf16>, vector<2x32xbf16> -> vector<2x64xbf16>
    %cst_23 = arith.constant dense<0.000000e+00> : vector<2x128xf32>
    %100 = tpu.matmul %99, %1, %cst_23 {dimension_numbers = #tpu.dot_dimension_numbers<[1], [0], [0], [1], [0, 0, 1, 1], [], []>} : vector<2x64xbf16>, vector<64x128xbf16>, vector<2x128xf32> -> vector<2x128xf32>
    %101 = arith.addf %100, %4 : vector<2x128xf32>
    %102 = vector.extract_strided_slice %101 {offsets = [0, 0], sizes = [2, 96], strides = [1, 1]} : vector<2x128xf32> to vector<2x96xf32>
    %103 = arith.negf %102 : vector<2x96xf32>
    %104 = math.exp %103 : vector<2x96xf32>
    %cst_24 = arith.constant 1.000000e+00 : f32
    %105 = vector.broadcast %cst_24 : f32 to vector<2x96xf32>
    %106 = arith.addf %105, %104 : vector<2x96xf32>
    %107 = arith.divf %105, %106 : vector<2x96xf32>
    %108 = vector.extract_strided_slice %101 {offsets = [0, 96], sizes = [2, 32], strides = [1, 1]} : vector<2x128xf32> to vector<2x32xf32>
    %109 = math.tanh %108 : vector<2x32xf32>
    %110 = vector.extract_strided_slice %107 {offsets = [0, 0], sizes = [2, 32], strides = [1, 1]} : vector<2x96xf32> to vector<2x32xf32>
    %111 = vector.extract_strided_slice %107 {offsets = [0, 32], sizes = [2, 32], strides = [1, 1]} : vector<2x96xf32> to vector<2x32xf32>
    %112 = vector.extract_strided_slice %107 {offsets = [0, 64], sizes = [2, 32], strides = [1, 1]} : vector<2x96xf32> to vector<2x32xf32>
    %113 = arith.mulf %111, %74 : vector<2x32xf32>
    %114 = arith.mulf %110, %109 : vector<2x32xf32>
    %115 = arith.addf %113, %114 : vector<2x32xf32>
    %116 = math.tanh %115 : vector<2x32xf32>
    %117 = arith.mulf %112, %116 : vector<2x32xf32>
    %118 = arith.truncf %117 : vector<2x32xf32> to vector<2x32xbf16>
    %119 = vector.extract_strided_slice %11 {offsets = [3, 0, 0], sizes = [1, 2, 128], strides = [1, 1, 1]} : vector<8x2x128xf32> to vector<1x2x128xf32>
    %120 = vector.shape_cast %119 : vector<1x2x128xf32> to vector<2x128xf32>
    %cst_25 = arith.constant dense<0.000000e+00> : vector<2x128xf32>
    %121 = tpu.matmul %98, %0, %cst_25 {dimension_numbers = #tpu.dot_dimension_numbers<[1], [0], [0], [1], [0, 0, 1, 1], [], []>} : vector<2x32xbf16>, vector<32x128xbf16>, vector<2x128xf32> -> vector<2x128xf32>
    %122 = arith.addf %120, %121 : vector<2x128xf32>
    %123 = vector.extract_strided_slice %122 {offsets = [0, 0], sizes = [2, 96], strides = [1, 1]} : vector<2x128xf32> to vector<2x96xf32>
    %124 = arith.negf %123 : vector<2x96xf32>
    %125 = math.exp %124 : vector<2x96xf32>
    %cst_26 = arith.constant 1.000000e+00 : f32
    %126 = vector.broadcast %cst_26 : f32 to vector<2x96xf32>
    %127 = arith.addf %126, %125 : vector<2x96xf32>
    %128 = arith.divf %126, %127 : vector<2x96xf32>
    %129 = vector.extract_strided_slice %122 {offsets = [0, 96], sizes = [2, 32], strides = [1, 1]} : vector<2x128xf32> to vector<2x32xf32>
    %130 = math.tanh %129 : vector<2x32xf32>
    %131 = vector.extract_strided_slice %128 {offsets = [0, 0], sizes = [2, 32], strides = [1, 1]} : vector<2x96xf32> to vector<2x32xf32>
    %132 = vector.extract_strided_slice %128 {offsets = [0, 32], sizes = [2, 32], strides = [1, 1]} : vector<2x96xf32> to vector<2x32xf32>
    %133 = vector.extract_strided_slice %128 {offsets = [0, 64], sizes = [2, 32], strides = [1, 1]} : vector<2x96xf32> to vector<2x32xf32>
    %134 = arith.mulf %132, %95 : vector<2x32xf32>
    %135 = arith.mulf %131, %130 : vector<2x32xf32>
    %136 = arith.addf %134, %135 : vector<2x32xf32>
    %137 = math.tanh %136 : vector<2x32xf32>
    %138 = arith.mulf %133, %137 : vector<2x32xf32>
    %139 = arith.truncf %138 : vector<2x32xf32> to vector<2x32xbf16>
    %140 = tpu.concatenate %98, %118 in 1 : vector<2x32xbf16>, vector<2x32xbf16> -> vector<2x64xbf16>
    %cst_27 = arith.constant dense<0.000000e+00> : vector<2x128xf32>
    %141 = tpu.matmul %140, %1, %cst_27 {dimension_numbers = #tpu.dot_dimension_numbers<[1], [0], [0], [1], [0, 0, 1, 1], [], []>} : vector<2x64xbf16>, vector<64x128xbf16>, vector<2x128xf32> -> vector<2x128xf32>
    %142 = arith.addf %141, %4 : vector<2x128xf32>
    %143 = vector.extract_strided_slice %142 {offsets = [0, 0], sizes = [2, 96], strides = [1, 1]} : vector<2x128xf32> to vector<2x96xf32>
    %144 = arith.negf %143 : vector<2x96xf32>
    %145 = math.exp %144 : vector<2x96xf32>
    %cst_28 = arith.constant 1.000000e+00 : f32
    %146 = vector.broadcast %cst_28 : f32 to vector<2x96xf32>
    %147 = arith.addf %146, %145 : vector<2x96xf32>
    %148 = arith.divf %146, %147 : vector<2x96xf32>
    %149 = vector.extract_strided_slice %142 {offsets = [0, 96], sizes = [2, 32], strides = [1, 1]} : vector<2x128xf32> to vector<2x32xf32>
    %150 = math.tanh %149 : vector<2x32xf32>
    %151 = vector.extract_strided_slice %148 {offsets = [0, 0], sizes = [2, 32], strides = [1, 1]} : vector<2x96xf32> to vector<2x32xf32>
    %152 = vector.extract_strided_slice %148 {offsets = [0, 32], sizes = [2, 32], strides = [1, 1]} : vector<2x96xf32> to vector<2x32xf32>
    %153 = vector.extract_strided_slice %148 {offsets = [0, 64], sizes = [2, 32], strides = [1, 1]} : vector<2x96xf32> to vector<2x32xf32>
    %154 = arith.mulf %152, %115 : vector<2x32xf32>
    %155 = arith.mulf %151, %150 : vector<2x32xf32>
    %156 = arith.addf %154, %155 : vector<2x32xf32>
    %157 = math.tanh %156 : vector<2x32xf32>
    %158 = arith.mulf %153, %157 : vector<2x32xf32>
    %159 = arith.truncf %158 : vector<2x32xf32> to vector<2x32xbf16>
    %160 = vector.extract_strided_slice %11 {offsets = [4, 0, 0], sizes = [1, 2, 128], strides = [1, 1, 1]} : vector<8x2x128xf32> to vector<1x2x128xf32>
    %161 = vector.shape_cast %160 : vector<1x2x128xf32> to vector<2x128xf32>
    %cst_29 = arith.constant dense<0.000000e+00> : vector<2x128xf32>
    %162 = tpu.matmul %139, %0, %cst_29 {dimension_numbers = #tpu.dot_dimension_numbers<[1], [0], [0], [1], [0, 0, 1, 1], [], []>} : vector<2x32xbf16>, vector<32x128xbf16>, vector<2x128xf32> -> vector<2x128xf32>
    %163 = arith.addf %161, %162 : vector<2x128xf32>
    %164 = vector.extract_strided_slice %163 {offsets = [0, 0], sizes = [2, 96], strides = [1, 1]} : vector<2x128xf32> to vector<2x96xf32>
    %165 = arith.negf %164 : vector<2x96xf32>
    %166 = math.exp %165 : vector<2x96xf32>
    %cst_30 = arith.constant 1.000000e+00 : f32
    %167 = vector.broadcast %cst_30 : f32 to vector<2x96xf32>
    %168 = arith.addf %167, %166 : vector<2x96xf32>
    %169 = arith.divf %167, %168 : vector<2x96xf32>
    %170 = vector.extract_strided_slice %163 {offsets = [0, 96], sizes = [2, 32], strides = [1, 1]} : vector<2x128xf32> to vector<2x32xf32>
    %171 = math.tanh %170 : vector<2x32xf32>
    %172 = vector.extract_strided_slice %169 {offsets = [0, 0], sizes = [2, 32], strides = [1, 1]} : vector<2x96xf32> to vector<2x32xf32>
    %173 = vector.extract_strided_slice %169 {offsets = [0, 32], sizes = [2, 32], strides = [1, 1]} : vector<2x96xf32> to vector<2x32xf32>
    %174 = vector.extract_strided_slice %169 {offsets = [0, 64], sizes = [2, 32], strides = [1, 1]} : vector<2x96xf32> to vector<2x32xf32>
    %175 = arith.mulf %173, %136 : vector<2x32xf32>
    %176 = arith.mulf %172, %171 : vector<2x32xf32>
    %177 = arith.addf %175, %176 : vector<2x32xf32>
    %178 = math.tanh %177 : vector<2x32xf32>
    %179 = arith.mulf %174, %178 : vector<2x32xf32>
    %180 = arith.truncf %179 : vector<2x32xf32> to vector<2x32xbf16>
    %181 = tpu.concatenate %139, %159 in 1 : vector<2x32xbf16>, vector<2x32xbf16> -> vector<2x64xbf16>
    %cst_31 = arith.constant dense<0.000000e+00> : vector<2x128xf32>
    %182 = tpu.matmul %181, %1, %cst_31 {dimension_numbers = #tpu.dot_dimension_numbers<[1], [0], [0], [1], [0, 0, 1, 1], [], []>} : vector<2x64xbf16>, vector<64x128xbf16>, vector<2x128xf32> -> vector<2x128xf32>
    %183 = arith.addf %182, %4 : vector<2x128xf32>
    %184 = vector.extract_strided_slice %183 {offsets = [0, 0], sizes = [2, 96], strides = [1, 1]} : vector<2x128xf32> to vector<2x96xf32>
    %185 = arith.negf %184 : vector<2x96xf32>
    %186 = math.exp %185 : vector<2x96xf32>
    %cst_32 = arith.constant 1.000000e+00 : f32
    %187 = vector.broadcast %cst_32 : f32 to vector<2x96xf32>
    %188 = arith.addf %187, %186 : vector<2x96xf32>
    %189 = arith.divf %187, %188 : vector<2x96xf32>
    %190 = vector.extract_strided_slice %183 {offsets = [0, 96], sizes = [2, 32], strides = [1, 1]} : vector<2x128xf32> to vector<2x32xf32>
    %191 = math.tanh %190 : vector<2x32xf32>
    %192 = vector.extract_strided_slice %189 {offsets = [0, 0], sizes = [2, 32], strides = [1, 1]} : vector<2x96xf32> to vector<2x32xf32>
    %193 = vector.extract_strided_slice %189 {offsets = [0, 32], sizes = [2, 32], strides = [1, 1]} : vector<2x96xf32> to vector<2x32xf32>
    %194 = vector.extract_strided_slice %189 {offsets = [0, 64], sizes = [2, 32], strides = [1, 1]} : vector<2x96xf32> to vector<2x32xf32>
    %195 = arith.mulf %193, %156 : vector<2x32xf32>
    %196 = arith.mulf %192, %191 : vector<2x32xf32>
    %197 = arith.addf %195, %196 : vector<2x32xf32>
    %198 = math.tanh %197 : vector<2x32xf32>
    %199 = arith.mulf %194, %198 : vector<2x32xf32>
    %200 = arith.truncf %199 : vector<2x32xf32> to vector<2x32xbf16>
    %201 = vector.extract_strided_slice %11 {offsets = [5, 0, 0], sizes = [1, 2, 128], strides = [1, 1, 1]} : vector<8x2x128xf32> to vector<1x2x128xf32>
    %202 = vector.shape_cast %201 : vector<1x2x128xf32> to vector<2x128xf32>
    %cst_33 = arith.constant dense<0.000000e+00> : vector<2x128xf32>
    %203 = tpu.matmul %180, %0, %cst_33 {dimension_numbers = #tpu.dot_dimension_numbers<[1], [0], [0], [1], [0, 0, 1, 1], [], []>} : vector<2x32xbf16>, vector<32x128xbf16>, vector<2x128xf32> -> vector<2x128xf32>
    %204 = arith.addf %202, %203 : vector<2x128xf32>
    %205 = vector.extract_strided_slice %204 {offsets = [0, 0], sizes = [2, 96], strides = [1, 1]} : vector<2x128xf32> to vector<2x96xf32>
    %206 = arith.negf %205 : vector<2x96xf32>
    %207 = math.exp %206 : vector<2x96xf32>
    %cst_34 = arith.constant 1.000000e+00 : f32
    %208 = vector.broadcast %cst_34 : f32 to vector<2x96xf32>
    %209 = arith.addf %208, %207 : vector<2x96xf32>
    %210 = arith.divf %208, %209 : vector<2x96xf32>
    %211 = vector.extract_strided_slice %204 {offsets = [0, 96], sizes = [2, 32], strides = [1, 1]} : vector<2x128xf32> to vector<2x32xf32>
    %212 = math.tanh %211 : vector<2x32xf32>
    %213 = vector.extract_strided_slice %210 {offsets = [0, 0], sizes = [2, 32], strides = [1, 1]} : vector<2x96xf32> to vector<2x32xf32>
    %214 = vector.extract_strided_slice %210 {offsets = [0, 32], sizes = [2, 32], strides = [1, 1]} : vector<2x96xf32> to vector<2x32xf32>
    %215 = vector.extract_strided_slice %210 {offsets = [0, 64], sizes = [2, 32], strides = [1, 1]} : vector<2x96xf32> to vector<2x32xf32>
    %216 = arith.mulf %214, %177 : vector<2x32xf32>
    %217 = arith.mulf %213, %212 : vector<2x32xf32>
    %218 = arith.addf %216, %217 : vector<2x32xf32>
    %219 = math.tanh %218 : vector<2x32xf32>
    %220 = arith.mulf %215, %219 : vector<2x32xf32>
    %221 = arith.truncf %220 : vector<2x32xf32> to vector<2x32xbf16>
    %222 = tpu.concatenate %180, %200 in 1 : vector<2x32xbf16>, vector<2x32xbf16> -> vector<2x64xbf16>
    %cst_35 = arith.constant dense<0.000000e+00> : vector<2x128xf32>
    %223 = tpu.matmul %222, %1, %cst_35 {dimension_numbers = #tpu.dot_dimension_numbers<[1], [0], [0], [1], [0, 0, 1, 1], [], []>} : vector<2x64xbf16>, vector<64x128xbf16>, vector<2x128xf32> -> vector<2x128xf32>
    %224 = arith.addf %223, %4 : vector<2x128xf32>
    %225 = vector.extract_strided_slice %224 {offsets = [0, 0], sizes = [2, 96], strides = [1, 1]} : vector<2x128xf32> to vector<2x96xf32>
    %226 = arith.negf %225 : vector<2x96xf32>
    %227 = math.exp %226 : vector<2x96xf32>
    %cst_36 = arith.constant 1.000000e+00 : f32
    %228 = vector.broadcast %cst_36 : f32 to vector<2x96xf32>
    %229 = arith.addf %228, %227 : vector<2x96xf32>
    %230 = arith.divf %228, %229 : vector<2x96xf32>
    %231 = vector.extract_strided_slice %224 {offsets = [0, 96], sizes = [2, 32], strides = [1, 1]} : vector<2x128xf32> to vector<2x32xf32>
    %232 = math.tanh %231 : vector<2x32xf32>
    %233 = vector.extract_strided_slice %230 {offsets = [0, 0], sizes = [2, 32], strides = [1, 1]} : vector<2x96xf32> to vector<2x32xf32>
    %234 = vector.extract_strided_slice %230 {offsets = [0, 32], sizes = [2, 32], strides = [1, 1]} : vector<2x96xf32> to vector<2x32xf32>
    %235 = vector.extract_strided_slice %230 {offsets = [0, 64], sizes = [2, 32], strides = [1, 1]} : vector<2x96xf32> to vector<2x32xf32>
    %236 = arith.mulf %234, %197 : vector<2x32xf32>
    %237 = arith.mulf %233, %232 : vector<2x32xf32>
    %238 = arith.addf %236, %237 : vector<2x32xf32>
    %239 = math.tanh %238 : vector<2x32xf32>
    %240 = arith.mulf %235, %239 : vector<2x32xf32>
    %241 = arith.truncf %240 : vector<2x32xf32> to vector<2x32xbf16>
    %242 = vector.extract_strided_slice %11 {offsets = [6, 0, 0], sizes = [1, 2, 128], strides = [1, 1, 1]} : vector<8x2x128xf32> to vector<1x2x128xf32>
    %243 = vector.shape_cast %242 : vector<1x2x128xf32> to vector<2x128xf32>
    %cst_37 = arith.constant dense<0.000000e+00> : vector<2x128xf32>
    %244 = tpu.matmul %221, %0, %cst_37 {dimension_numbers = #tpu.dot_dimension_numbers<[1], [0], [0], [1], [0, 0, 1, 1], [], []>} : vector<2x32xbf16>, vector<32x128xbf16>, vector<2x128xf32> -> vector<2x128xf32>
    %245 = arith.addf %243, %244 : vector<2x128xf32>
    %246 = vector.extract_strided_slice %245 {offsets = [0, 0], sizes = [2, 96], strides = [1, 1]} : vector<2x128xf32> to vector<2x96xf32>
    %247 = arith.negf %246 : vector<2x96xf32>
    %248 = math.exp %247 : vector<2x96xf32>
    %cst_38 = arith.constant 1.000000e+00 : f32
    %249 = vector.broadcast %cst_38 : f32 to vector<2x96xf32>
    %250 = arith.addf %249, %248 : vector<2x96xf32>
    %251 = arith.divf %249, %250 : vector<2x96xf32>
    %252 = vector.extract_strided_slice %245 {offsets = [0, 96], sizes = [2, 32], strides = [1, 1]} : vector<2x128xf32> to vector<2x32xf32>
    %253 = math.tanh %252 : vector<2x32xf32>
    %254 = vector.extract_strided_slice %251 {offsets = [0, 0], sizes = [2, 32], strides = [1, 1]} : vector<2x96xf32> to vector<2x32xf32>
    %255 = vector.extract_strided_slice %251 {offsets = [0, 32], sizes = [2, 32], strides = [1, 1]} : vector<2x96xf32> to vector<2x32xf32>
    %256 = vector.extract_strided_slice %251 {offsets = [0, 64], sizes = [2, 32], strides = [1, 1]} : vector<2x96xf32> to vector<2x32xf32>
    %257 = arith.mulf %255, %218 : vector<2x32xf32>
    %258 = arith.mulf %254, %253 : vector<2x32xf32>
    %259 = arith.addf %257, %258 : vector<2x32xf32>
    %260 = math.tanh %259 : vector<2x32xf32>
    %261 = arith.mulf %256, %260 : vector<2x32xf32>
    %262 = arith.truncf %261 : vector<2x32xf32> to vector<2x32xbf16>
    %263 = tpu.concatenate %221, %241 in 1 : vector<2x32xbf16>, vector<2x32xbf16> -> vector<2x64xbf16>
    %cst_39 = arith.constant dense<0.000000e+00> : vector<2x128xf32>
    %264 = tpu.matmul %263, %1, %cst_39 {dimension_numbers = #tpu.dot_dimension_numbers<[1], [0], [0], [1], [0, 0, 1, 1], [], []>} : vector<2x64xbf16>, vector<64x128xbf16>, vector<2x128xf32> -> vector<2x128xf32>
    %265 = arith.addf %264, %4 : vector<2x128xf32>
    %266 = vector.extract_strided_slice %265 {offsets = [0, 0], sizes = [2, 96], strides = [1, 1]} : vector<2x128xf32> to vector<2x96xf32>
    %267 = arith.negf %266 : vector<2x96xf32>
    %268 = math.exp %267 : vector<2x96xf32>
    %cst_40 = arith.constant 1.000000e+00 : f32
    %269 = vector.broadcast %cst_40 : f32 to vector<2x96xf32>
    %270 = arith.addf %269, %268 : vector<2x96xf32>
    %271 = arith.divf %269, %270 : vector<2x96xf32>
    %272 = vector.extract_strided_slice %265 {offsets = [0, 96], sizes = [2, 32], strides = [1, 1]} : vector<2x128xf32> to vector<2x32xf32>
    %273 = math.tanh %272 : vector<2x32xf32>
    %274 = vector.extract_strided_slice %271 {offsets = [0, 0], sizes = [2, 32], strides = [1, 1]} : vector<2x96xf32> to vector<2x32xf32>
    %275 = vector.extract_strided_slice %271 {offsets = [0, 32], sizes = [2, 32], strides = [1, 1]} : vector<2x96xf32> to vector<2x32xf32>
    %276 = vector.extract_strided_slice %271 {offsets = [0, 64], sizes = [2, 32], strides = [1, 1]} : vector<2x96xf32> to vector<2x32xf32>
    %277 = arith.mulf %275, %238 : vector<2x32xf32>
    %278 = arith.mulf %274, %273 : vector<2x32xf32>
    %279 = arith.addf %277, %278 : vector<2x32xf32>
    %280 = math.tanh %279 : vector<2x32xf32>
    %281 = arith.mulf %276, %280 : vector<2x32xf32>
    %282 = arith.truncf %281 : vector<2x32xf32> to vector<2x32xbf16>
    %283 = vector.extract_strided_slice %11 {offsets = [7, 0, 0], sizes = [1, 2, 128], strides = [1, 1, 1]} : vector<8x2x128xf32> to vector<1x2x128xf32>
    %284 = vector.shape_cast %283 : vector<1x2x128xf32> to vector<2x128xf32>
    %cst_41 = arith.constant dense<0.000000e+00> : vector<2x128xf32>
    %285 = tpu.matmul %262, %0, %cst_41 {dimension_numbers = #tpu.dot_dimension_numbers<[1], [0], [0], [1], [0, 0, 1, 1], [], []>} : vector<2x32xbf16>, vector<32x128xbf16>, vector<2x128xf32> -> vector<2x128xf32>
    %286 = arith.addf %284, %285 : vector<2x128xf32>
    %287 = vector.extract_strided_slice %286 {offsets = [0, 0], sizes = [2, 96], strides = [1, 1]} : vector<2x128xf32> to vector<2x96xf32>
    %288 = arith.negf %287 : vector<2x96xf32>
    %289 = math.exp %288 : vector<2x96xf32>
    %cst_42 = arith.constant 1.000000e+00 : f32
    %290 = vector.broadcast %cst_42 : f32 to vector<2x96xf32>
    %291 = arith.addf %290, %289 : vector<2x96xf32>
    %292 = arith.divf %290, %291 : vector<2x96xf32>
    %293 = vector.extract_strided_slice %286 {offsets = [0, 96], sizes = [2, 32], strides = [1, 1]} : vector<2x128xf32> to vector<2x32xf32>
    %294 = math.tanh %293 : vector<2x32xf32>
    %295 = vector.extract_strided_slice %292 {offsets = [0, 0], sizes = [2, 32], strides = [1, 1]} : vector<2x96xf32> to vector<2x32xf32>
    %296 = vector.extract_strided_slice %292 {offsets = [0, 32], sizes = [2, 32], strides = [1, 1]} : vector<2x96xf32> to vector<2x32xf32>
    %297 = vector.extract_strided_slice %292 {offsets = [0, 64], sizes = [2, 32], strides = [1, 1]} : vector<2x96xf32> to vector<2x32xf32>
    %298 = arith.mulf %296, %259 : vector<2x32xf32>
    %299 = arith.mulf %295, %294 : vector<2x32xf32>
    %300 = arith.addf %298, %299 : vector<2x32xf32>
    %301 = math.tanh %300 : vector<2x32xf32>
    %302 = arith.mulf %297, %301 : vector<2x32xf32>
    %303 = arith.truncf %302 : vector<2x32xf32> to vector<2x32xbf16>
    %304 = tpu.concatenate %262, %282 in 1 : vector<2x32xbf16>, vector<2x32xbf16> -> vector<2x64xbf16>
    %cst_43 = arith.constant dense<0.000000e+00> : vector<2x128xf32>
    %305 = tpu.matmul %304, %1, %cst_43 {dimension_numbers = #tpu.dot_dimension_numbers<[1], [0], [0], [1], [0, 0, 1, 1], [], []>} : vector<2x64xbf16>, vector<64x128xbf16>, vector<2x128xf32> -> vector<2x128xf32>
    %306 = arith.addf %305, %4 : vector<2x128xf32>
    %307 = vector.extract_strided_slice %306 {offsets = [0, 0], sizes = [2, 96], strides = [1, 1]} : vector<2x128xf32> to vector<2x96xf32>
    %308 = arith.negf %307 : vector<2x96xf32>
    %309 = math.exp %308 : vector<2x96xf32>
    %cst_44 = arith.constant 1.000000e+00 : f32
    %310 = vector.broadcast %cst_44 : f32 to vector<2x96xf32>
    %311 = arith.addf %310, %309 : vector<2x96xf32>
    %312 = arith.divf %310, %311 : vector<2x96xf32>
    %313 = vector.extract_strided_slice %306 {offsets = [0, 96], sizes = [2, 32], strides = [1, 1]} : vector<2x128xf32> to vector<2x32xf32>
    %314 = math.tanh %313 : vector<2x32xf32>
    %315 = vector.extract_strided_slice %312 {offsets = [0, 0], sizes = [2, 32], strides = [1, 1]} : vector<2x96xf32> to vector<2x32xf32>
    %316 = vector.extract_strided_slice %312 {offsets = [0, 32], sizes = [2, 32], strides = [1, 1]} : vector<2x96xf32> to vector<2x32xf32>
    %317 = vector.extract_strided_slice %312 {offsets = [0, 64], sizes = [2, 32], strides = [1, 1]} : vector<2x96xf32> to vector<2x32xf32>
    %318 = arith.mulf %316, %279 : vector<2x32xf32>
    %319 = arith.mulf %315, %314 : vector<2x32xf32>
    %320 = arith.addf %318, %319 : vector<2x32xf32>
    %321 = math.tanh %320 : vector<2x32xf32>
    %322 = arith.mulf %317, %321 : vector<2x32xf32>
    %323 = arith.truncf %322 : vector<2x32xf32> to vector<2x32xbf16>
    %324 = tpu.concatenate %303, %323 in 1 : vector<2x32xbf16>, vector<2x32xbf16> -> vector<2x64xbf16>
    %cst_45 = arith.constant dense<0.000000e+00> : vector<2x128xf32>
    %325 = tpu.matmul %324, %1, %cst_45 {dimension_numbers = #tpu.dot_dimension_numbers<[1], [0], [0], [1], [0, 0, 1, 1], [], []>} : vector<2x64xbf16>, vector<64x128xbf16>, vector<2x128xf32> -> vector<2x128xf32>
    %326 = arith.addf %325, %4 : vector<2x128xf32>
    %327 = vector.extract_strided_slice %326 {offsets = [0, 0], sizes = [2, 96], strides = [1, 1]} : vector<2x128xf32> to vector<2x96xf32>
    %328 = arith.negf %327 : vector<2x96xf32>
    %329 = math.exp %328 : vector<2x96xf32>
    %cst_46 = arith.constant 1.000000e+00 : f32
    %330 = vector.broadcast %cst_46 : f32 to vector<2x96xf32>
    %331 = arith.addf %330, %329 : vector<2x96xf32>
    %332 = arith.divf %330, %331 : vector<2x96xf32>
    %333 = vector.extract_strided_slice %326 {offsets = [0, 96], sizes = [2, 32], strides = [1, 1]} : vector<2x128xf32> to vector<2x32xf32>
    %334 = math.tanh %333 : vector<2x32xf32>
    %335 = vector.extract_strided_slice %332 {offsets = [0, 0], sizes = [2, 32], strides = [1, 1]} : vector<2x96xf32> to vector<2x32xf32>
    %336 = vector.extract_strided_slice %332 {offsets = [0, 32], sizes = [2, 32], strides = [1, 1]} : vector<2x96xf32> to vector<2x32xf32>
    %337 = vector.extract_strided_slice %332 {offsets = [0, 64], sizes = [2, 32], strides = [1, 1]} : vector<2x96xf32> to vector<2x32xf32>
    %338 = arith.mulf %336, %320 : vector<2x32xf32>
    %339 = arith.mulf %335, %334 : vector<2x32xf32>
    %340 = arith.addf %338, %339 : vector<2x32xf32>
    %341 = math.tanh %340 : vector<2x32xf32>
    %342 = arith.mulf %337, %341 : vector<2x32xf32>
    %343 = arith.truncf %342 : vector<2x32xf32> to vector<2x32xbf16>
    %c0_47 = arith.constant 0 : index
    %c0_48 = arith.constant 0 : index
    %344 = vector.load %arg6[%c0_47, %c0_48] : memref<32x32xbf16, #tpu.memory_space<vmem>>, vector<32x32xbf16>
    %cst_49 = arith.constant dense<0.000000e+00> : vector<2x32xf32>
    %345 = tpu.matmul %343, %344, %cst_49 {dimension_numbers = #tpu.dot_dimension_numbers<[1], [0], [0], [1], [0, 0, 1, 1], [], []>} : vector<2x32xbf16>, vector<32x32xbf16>, vector<2x32xf32> -> vector<2x32xf32>
    %c0_50 = arith.constant 0 : index
    %c0_51 = arith.constant 0 : index
    %346 = vector.load %arg7[%c0_50, %c0_51] : memref<1x32xf32, #tpu.memory_space<vmem>>, vector<1x32xf32>
    %347 = vector.broadcast %346 : vector<1x32xf32> to vector<2x32xf32>
    %348 = arith.addf %345, %347 : vector<2x32xf32>
    %cst_52 = arith.constant 0.000000e+00 : f32
    %349 = vector.broadcast %cst_52 : f32 to vector<2x32xf32>
    %350 = arith.maximumf %348, %349 : vector<2x32xf32>
    %351 = arith.truncf %350 : vector<2x32xf32> to vector<2x32xbf16>
    %c0_53 = arith.constant 0 : index
    %c0_54 = arith.constant 0 : index
    %352 = vector.load %arg8[%c0_53, %c0_54] : memref<32x24xbf16, #tpu.memory_space<vmem>>, vector<32x24xbf16>
    %cst_55 = arith.constant dense<0.000000e+00> : vector<2x24xf32>
    %353 = tpu.matmul %351, %352, %cst_55 {dimension_numbers = #tpu.dot_dimension_numbers<[1], [0], [0], [1], [0, 0, 1, 1], [], []>} : vector<2x32xbf16>, vector<32x24xbf16>, vector<2x24xf32> -> vector<2x24xf32>
    %c0_56 = arith.constant 0 : index
    %c0_57 = arith.constant 0 : index
    %354 = vector.load %arg9[%c0_56, %c0_57] : memref<1x24xf32, #tpu.memory_space<vmem>>, vector<1x24xf32>
    %355 = vector.broadcast %354 : vector<1x24xf32> to vector<2x24xf32>
    %356 = arith.addf %353, %355 : vector<2x24xf32>
    %c0_58 = arith.constant 0 : index
    %c0_59 = arith.constant 0 : index
    %357 = vector.load %arg10[%c0_58, %c0_59] : memref<2x24xf32, #tpu.memory_space<vmem>>, vector<2x24xf32>
    tpu.vector_store %arg10[%c0_58, %c0_59], %356 {strides = array<i32>} : memref<2x24xf32, #tpu.memory_space<vmem>>, vector<2x24xf32>,
    return
  }
}

</mosaic_0001>

<bundles_post_ra>
// kernel: tpu_custom_call.1
= control target key start
LH: loop header
LB: loop body
LE: loop exit
PB: predicated region body
PF: predicated region fallthrough
CT: control target
= control target key end

     0   :  { %15 = vsyncpa [#allocation3], 0  ;;  %s2559_s0 = inlined_call_operand.vmem [shape: bf16[16,4], index: 0, kind: input, shape index: {}]   ;;  %s2560_s1 = inlined_call_operand.hbm [shape: bf16[4,128], index: 1, kind: input, shape index: {}]   ;;  %s2561_s2 = inlined_call_operand.hbm [shape: bf16[32,128], index: 2, kind: input, shape index: {}]   ;;  %s2562_s3 = inlined_call_operand.hbm [shape: f32[1,128], index: 3, kind: input, shape index: {}]   ;;  %s2563_s4 = inlined_call_operand.vmem [shape: bf16[64,128], index: 4, kind: input, shape index: {}]   ;;  %s2564_s5 = inlined_call_operand.hbm [shape: f32[1,128], index: 5, kind: input, shape index: {}]   ;;  %s2565_s6 = inlined_call_operand.vmem [shape: bf16[32,32], index: 6, kind: input, shape index: {}]   ;;  %s2566_s7 = inlined_call_operand.vmem [shape: f32[1,32], index: 7, kind: input, shape index: {}]   ;;  %s2567_s8 = inlined_call_operand.vmem [shape: bf16[32,24], index: 8, kind: input, shape index: {}]   ;;  %s2568_s9 = inlined_call_operand.vmem [shape: f32[1,24], index: 9, kind: input, shape index: {}]   ;;  %s2569_s10 = inlined_call_operand.hbm [shape: f32[2,24], index: 10, kind: output, shape index: {}]  }
   0x1   :  { %16 = vsyncpa [#allocation6], 0 }
   0x2   :  { %17 = vsyncpa [#allocation9], 0 }
   0x3   :  { %18 = vsyncpa [#allocation4], 0  ;;  %s2119_s13 = smov [#allocation5]  }
   0x4   :  { %s36_s14 = sshll.u32 %s2119_s13, 4  ;;  %s37_s14 = int_to_ptr.vmem [resolvable:$true] %s36_s14 }
   0x5   :  { %s2019_s15 = scalar_lea.vmem %s37_s14, 256  ;;  %p2024_p1 = scmp.lt.s32.totalorder %s37_s14, %s37_s14 }
   0x6   :  { %p2020_p0 = scmp.ne.s32.totalorder %s37_s14, %s2019_s15  ;;  %p2025_p2 = scmp.lt.s32.totalorder %s2019_s15, %s2019_s15 }
   0x8   :  { %p2026_p3 = por %p2025_p2, %p2024_p1 }
   0xa   :  { %p2027_p4 = pnand %p2026_p3, %p2020_p0 }
   0xc   :  { %2030 = shalt.err (!%p2027_p4)
}
   0xd   :  { %s2120_s16 = smov 64   ;;  %s2121_s17 = smov 4  }
   0xe   :  { %42 = dma.hbm_to_vmem [thread:$0]  %s2561_s2, 256, %s37_s14, [#allocation6], %s2120_s16, %s2120_s16, %s2121_s17  }
   0xf   :  { %s2122_s20 = smov [#allocation2]   ;;  %s2123_s22 = smov [#allocation7]  }
  0x10   :  { %s27_s21 = sshll.u32 %s2122_s20, 4  ;;  %s49_s23 = sshll.u32 %s2123_s22, 4  ;;  %s28_s21 = int_to_ptr.vmem [resolvable:$true] %s27_s21  ;;  %s50_s23 = int_to_ptr.vmem [resolvable:$true] %s49_s23 }
  0x11   :  { %s2039_s24 = scalar_lea.vmem %s28_s21, 32  ;;  %p2044_p6 = scmp.lt.s32.totalorder %s28_s21, %s28_s21 }
  0x12   :  { %p2040_p5 = scmp.ne.s32.totalorder %s28_s21, %s2039_s24  ;;  %p2045_p7 = scmp.lt.s32.totalorder %s2039_s24, %s2039_s24 }
  0x14   :  { %p2046_p8 = por %p2045_p7, %p2044_p6 }
  0x16   :  { %p2047_p9 = pnand %p2046_p8, %p2040_p5 }
  0x18   :  { %2050 = shalt.err (!%p2047_p9)
}
  0x19   :  { %30 = dma.hbm_to_vmem [thread:$0]  %s2560_s1, 32, %s28_s21, [#allocation3]  }
  0x1a   :  { %s2059_s27 = scalar_lea.vmem %s50_s23, 16  ;;  %s2063_s2 = scalar_lea.vmem %s50_s23, 32 }
  0x1b   :  { %p2060_p10 = scmp.ne.s32.totalorder %s50_s23, %s2059_s27  ;;  %p2064_p11 = scmp.lt.s32.totalorder %s50_s23, %s50_s23 }
  0x1c   :  { %p2065_p12 = scmp.lt.s32.totalorder %s2063_s2, %s2059_s27 }
  0x1e   :  { %p2066_p13 = por %p2065_p12, %p2064_p11 }
  0x20   :  { %p2067_p0 = pnand %p2066_p13, %p2060_p10 }
  0x22   :  { %2070 = shalt.err (!%p2067_p0)
}
  0x23   :  { %52 = dma.hbm_to_vmem [thread:$0]  %s2562_s3, 16, %s50_s23, [#allocation6]  }
  0x24   :  { %s2124_s30 = smov [#allocation8]  }
  0x25   :  { %s61_s11 = sshll.u32 %s2124_s30, 4  ;;  %s62_s11 = int_to_ptr.vmem [resolvable:$true] %s61_s11 }
  0x26   :  { %s2079_s12 = scalar_lea.vmem %s62_s11, 16  ;;  %s2083_s13 = scalar_lea.vmem %s62_s11, 32 }
  0x27   :  { %p2080_p1 = scmp.ne.s32.totalorder %s62_s11, %s2079_s12  ;;  %p2084_p2 = scmp.lt.s32.totalorder %s62_s11, %s62_s11 }
  0x28   :  { %p2085_p3 = scmp.lt.s32.totalorder %s2083_s13, %s2079_s12 }
  0x2a   :  { %p2086_p4 = por %p2085_p3, %p2084_p2 }
  0x2c   :  { %p2087_p5 = pnand %p2086_p4, %p2080_p1 }
  0x2e   :  { %2090 = shalt.err (!%p2087_p5)
}
  0x2f   :  { %64 = dma.hbm_to_vmem [thread:$0]  %s2564_s5, 16, %s62_s11, [#allocation9]  }
  0x30   :  { %2111 = dma.done.wait [#allocation3], 32  }
  0x31   :  { %2112 = vsyncadd [#allocation3], 4294967264 }
  0x32   :  { %2113 = dma.done.wait [#allocation6], 272  }
  0x33   :  { %2114 = vsyncadd [#allocation6], 4294967024 }
  0x34   :  { %2115 = dma.done.wait [#allocation9], 16  }
  0x35   :  { %2116 = vsyncadd [#allocation9], 4294967280  ;;  %v2125_v0 = vmov 0.0   ;;  %vm2126_vm0 = vmmov 0   ;;  %vm124_vm1 = vcmask 1041408   ;;  %v2207_v3 = vld [vmem:[#allocation5 + $0x8] sm:$0xff]   ;;  %v175_v9 = vlaneseq }
  0x36   :  { %1677 = vmatprep.subr.bf16.mxu0 %v2125_v0  ;;  %1683 = vmatprep.subr.bf16.mxu1 %v2125_v0  ;;  %v107_v1 = vld [vmem:[#allocation2] sm:$0x3]  ;;  %v1873_v4 = vld [vmem:[%s2559_s0] sm:$0xff]   ;;  %vm120_vm2 = vcmask 31744   ;;  %v2213_v5 = vld [vmem:[#allocation5] sm:$0xff]   ;;  %v2127_v6 = vmov 0  }
  0x37   :  { %1679 = vmatprep.mubr.msk.bf16.mxu0 %vm2126_vm0, %v2125_v0  ;;  %1687 = vmatprep.mubr.msk.bf16.mxu1 %vm2126_vm0, %v2125_v0  ;;  %v126_v2 = vsel %vm124_vm1, %v107_v1, 0  ;;  %v2128_v7 = vmov 1983009808   ;;  %v176_v11 = vshrl.u32 %v175_v9, 7  ;;  %v1557_v12 = vld [vmem:[#allocation7] ss:$0 sm:$0xff] }
  0x38   :  { %1678 = vmatpush3.bf16.msra.mxu0 %v126_v2  ;;  %1684 = vmatpush3.bf16.msra.mxu1 %v2207_v3  ;;  %v173_v8 = vunpack.c.l.s4 %v2128_v7  ;;  %s2129_s0 = smov 32   ;;  %v2244_v41 = vld [vmem:[%s2563_s4 + $0x18] sm:$0xff]   ;;  %v2250_v42 = vld [vmem:[%s2563_s4 + $0x10] sm:$0xff]   ;;  %v2257_v43 = vld [vmem:[%s2563_s4 + $0x8] sm:$0xff]   ;;  %vm225_vm3 = vcmask 261120   ;;  %vm392_vm4 = vcmask 523264  }
  0x39   :  { %1691 = vmatprep.subr.bf16.mxu0 %v2125_v0  ;;  %1685 = vmatprep.subr.bf16.mxu1 %v2125_v0  ;;  %v2265_v45 = vld [vmem:[%s2563_s4] sm:$0xff]   ;;  %s2130_s4 = smov 96   ;;  %s2131_s13 = smov [#allocation10]   ;;  %vm1537_vm5 = vcmask 189440  }
  0x3a   :  { %v174_v10 = vunpack.c.0.s8 %v173_v8  ;;  %v2288_v52 = vld [vmem:[#allocation8] ss:$0 sm:$0xff] }
  0x3b   :  { %1680 = vmatmul.mubr.msk.bf16.vlgmr.msra.gmra.mxu0 %vm120_vm2, %v1873_v4 }
  0x3c   :  { %1692 = vmatpush3.bf16.msra.mxu0 %v2207_v3  ;;  %1695 = vmatprep.mubr.msk.bf16.mxu0 %vm2126_vm0, %v2125_v0  ;;  %v177_v13 = vsub.s32 %v174_v10, %v176_v11 }
  0x3d   :  { %1686 = vmatpush3.bf16.msra.mxu1 %v2213_v5  ;;  %1693 = vmatprep.subr.bf16.mxu0 %v2125_v0 }
  0x3e   :  { %1699 = vmatprep.subr.bf16.mxu1 %v2125_v0 }
  0x40   :  { %1688 = vmatmul.mubr.bf16.vlgmr.msra.gmra.mxu1 %v2127_v6  ;;  %1694 = vmatpush3.bf16.msra.mxu0 %v2213_v5 }
  0x41   :  { %1707 = vmatprep.mubr.msk.bf16.mxu1 %vm2126_vm0, %v2125_v0  ;;  %1711 = vmatprep.subr.bf16.mxu0 %v2125_v0 }
  0x42   :  { %1700 = vmatpush3.bf16.msra.mxu1 %v2244_v41 }
  0x43   :  { %1701 = vmatprep.subr.bf16.mxu1 %v2125_v0 }
  0x46   :  { %1702 = vmatpush3.bf16.msra.mxu1 %v2250_v42 }
  0x47   :  { %1703 = vmatprep.subr.bf16.mxu1 %v2125_v0 }
  0x4a   :  { %1704 = vmatpush3.bf16.msra.mxu1 %v2257_v43 }
  0x4b   :  { %1705 = vmatprep.subr.bf16.mxu1 %v2125_v0 }
  0x4e   :  { %1706 = vmatpush3.bf16.msra.mxu1 %v2265_v45 }
  0x4f   :  { %1731 = vmatprep.subr.bf16.mxu1 %v2125_v0 }
  0xfb   :  { %v162_v14 = vpop.f32.mrf.mxu0 }
  0xfc   :  { %v163_v15 = vadd.f32 %v1557_v12, %v162_v14 }
  0xfd   :  { %v1681_v16 = vpop.f32.mrf.mxu0 }
  0xfe   :  { %v171_v17 = vcombine.high %v163_v15, %v163_v15  ;;  %v2227_v18 = vrot.slane %v163_v15, %v177_v13 }
  0xff   :  { %v165_v19 = vpop.f32.mrf.mxu0 }
 0x100   :  { %v166_v20 = vadd.f32 %v1557_v12, %v165_v19  ;;  %v263_v21 = vpop.f32.mrf.mxu1  ;;  %v2229_v22 = vrot.slane %v171_v17, %v177_v13  ;;  %v186_v51 = vcombine.high %v2227_v18, %v2227_v18 }
 0x101   :  { %v269_v23 = vadd.f32 %v263_v21, %v2227_v18  ;;  %v1682_v24 = vpop.f32.mrf.mxu0 }
 0x102   :  { %v188_v25 = vcombine.high %v166_v20, %v166_v20  ;;  %v1689_v26 = vpop.f32.mrf.mxu1  ;;  %v2232_v27 = vrot.slane %v166_v20, %v177_v13 }
 0x103   :  { %1883 = vtanh.f32 %v269_v23  ;;  %v1562_v32 = vmul.f32 -1.442695, %v269_v23 }
 0x104   :  { %v266_v28 = vpop.f32.mrf.mxu1  ;;  %v2234_v29 = vrot.slane %v188_v25, %v177_v13 }
 0x105   :  { %1885 = vpow2.f32 %v1562_v32 }
 0x106   :  { %v1690_v30 = vpop.f32.mrf.mxu1 }
 0x110   :  { %v1884_v31 = vpop.eup %1883 }
 0x111   :  { %279 = vrot.lane.b32.xlu0 %v1884_v31, %s2129_s0 }
 0x112   :  { %v1886_v33 = vpop.eup %1885 }
 0x113   :  { %v273_v34 = vadd.f32 1.0, %v1886_v33 }
 0x115   :  { %1887 = vrcp.f32 %v273_v34 }
 0x122   :  { %v1888_v35 = vpop.eup %1887 }
 0x123   :  { %v277_v38 = vmul.f32 0.0, %v1888_v35 }
 0x183   :  { %v280_v36 = vpop.permute.xlu0 %279 }
 0x184   :  { %v282_v37 = vmul.f32 %v1888_v35, %v280_v36 }
 0x186   :  { %284 = vrot.lane.b32.xlu0 %v282_v37, %s2129_s0 }
 0x1f8   :  { %v285_v39 = vpop.permute.xlu0 %284 }
 0x1f9   :  { %v2238_v40 = vadd.f32 %v285_v39, %v277_v38 }
 0x1fb   :  { %1889 = vtanh.f32 %v2238_v40 }
 0x208   :  { %v1890_v44 = vpop.eup %1889 }
 0x209   :  { %290 = vrot.lane.b32.xlu1 %v1890_v44, %s2129_s0 }
 0x27b   :  { %v291_v46 = vpop.permute.xlu1 %290 }
 0x27c   :  { %v293_v47 = vmul.f32 %v1888_v35, %v291_v46 }
 0x27e   :  { %v294_v48 = vpack.c.bf16 %v293_v47, %v293_v47 }
 0x280   :  { %296 = vrot.lane.b32.xlu1 %v294_v48, %s2120_s16 }
 0x2f2   :  { %v297_v49 = vpop.permute.xlu1 %296 }
 0x2f3   :  { %v367_v50 = vsel %vm225_vm3, %v297_v49, 0  ;;  %1696 = vmatmul.mubr.msk.bf16.vlgmr.msra.gmra.mxu0 %vm225_vm3, %v297_v49 }
 0x2f4   :  { %1708 = vmatmul.mubr.msk.bf16.vlgmr.msra.gmra.mxu1 %vm392_vm4, %v367_v50  ;;  %1712 = vmatpush3.bf16.msra.mxu0 %v2207_v3 }
 0x2f5   :  { %1713 = vmatprep.subr.bf16.mxu0 %v2125_v0  ;;  %1715 = vmatprep.mubr.msk.bf16.mxu0 %vm2126_vm0, %v2125_v0 }
 0x2f6   :  { %1732 = vmatpush3.bf16.msra.mxu1 %v2207_v3  ;;  %1735 = vmatprep.mubr.msk.bf16.mxu1 %vm2126_vm0, %v2125_v0 }
 0x2f7   :  { %1733 = vmatprep.subr.bf16.mxu1 %v2125_v0 }
 0x2f8   :  { %1714 = vmatpush3.bf16.msra.mxu0 %v2213_v5 }
 0x2f9   :  { %1719 = vmatprep.subr.bf16.mxu0 %v2125_v0 }
 0x2fa   :  { %1734 = vmatpush3.bf16.msra.mxu1 %v2213_v5 }
 0x2fb   :  { %1739 = vmatprep.subr.bf16.mxu1 %v2125_v0 }
 0x3b3   :  { %v335_v53 = vpop.f32.mrf.mxu0 }
 0x3b4   :  { %v341_v54 = vadd.f32 %v335_v53, %v186_v51  ;;  %v429_v55 = vpop.f32.mrf.mxu1 }
 0x3b5   :  { %v430_v56 = vadd.f32 %v2288_v52, %v429_v55  ;;  %v1697_v57 = vpop.f32.mrf.mxu0 }
 0x3b6   :  { %1891 = vtanh.f32 %v341_v54  ;;  %v1709_v58 = vpop.f32.mrf.mxu1  ;;  %v1564_v2 = vmul.f32 -1.442695, %v341_v54 }
 0x3b7   :  { %1893 = vtanh.f32 %v430_v56  ;;  %v338_v59 = vpop.f32.mrf.mxu0  ;;  %v1570_v4 = vmul.f32 -1.442695, %v430_v56 }
 0x3b8   :  { %v432_v60 = vpop.f32.mrf.mxu1  ;;  %1895 = vpow2.f32 %v1564_v2 }
 0x3b9   :  { %v1698_v61 = vpop.f32.mrf.mxu0  ;;  %1897 = vpow2.f32 %v1570_v4 }
 0x3ba   :  { %v1710_v62 = vpop.f32.mrf.mxu1 }
 0x3c3   :  { %v1892_v63 = vpop.eup %1891 }
 0x3c4   :  { %v1894_v1 = vpop.eup %1893  ;;  %351 = vrot.lane.b32.xlu0 %v1892_v63, %s2129_s0 }
 0x3c5   :  { %444 = vrot.lane.b32.xlu1 %v1894_v1, %s2129_s0  ;;  %v1896_v6 = vpop.eup %1895 }
 0x3c6   :  { %v1898_v7 = vpop.eup %1897  ;;  %v345_v8 = vadd.f32 1.0, %v1896_v6 }
 0x3c7   :  { %v438_v9 = vadd.f32 1.0, %v1898_v7 }
 0x3c8   :  { %1899 = vrcp.f32 %v345_v8 }
 0x3c9   :  { %1901 = vrcp.f32 %v438_v9 }
 0x3d5   :  { %v1900_v10 = vpop.eup %1899 }
 0x3d6   :  { %v1902_v12 = vpop.eup %1901  ;;  %v349_v16 = vmul.f32 %v1900_v10, %v2238_v40 }
 0x3d7   :  { %v442_v18 = vmul.f32 0.0, %v1902_v12 }
 0x436   :  { %v352_v11 = vpop.permute.xlu0 %351 }
 0x437   :  { %v354_v13 = vmul.f32 %v1900_v10, %v352_v11  ;;  %v445_v14 = vpop.permute.xlu1 %444 }
 0x438   :  { %v447_v15 = vmul.f32 %v1902_v12, %v445_v14 }
 0x439   :  { %356 = vrot.lane.b32.xlu0 %v354_v13, %s2129_s0 }
 0x43a   :  { %449 = vrot.lane.b32.xlu1 %v447_v15, %s2129_s0 }
 0x4ab   :  { %v357_v17 = vpop.permute.xlu0 %356 }
 0x4ac   :  { %v2296_v19 = vadd.f32 %v357_v17, %v349_v16  ;;  %v450_v20 = vpop.permute.xlu1 %449 }
 0x4ad   :  { %v2298_v21 = vadd.f32 %v450_v20, %v442_v18 }
 0x4ae   :  { %1903 = vtanh.f32 %v2296_v19 }
 0x4af   :  { %1905 = vtanh.f32 %v2298_v21 }
 0x4bb   :  { %v1904_v23 = vpop.eup %1903 }
 0x4bc   :  { %v1906_v24 = vpop.eup %1905  ;;  %362 = vrot.lane.b32.xlu0 %v1904_v23, %s2129_s0 }
 0x4bd   :  { %455 = vrot.lane.b32.xlu1 %v1906_v24, %s2129_s0 }
 0x52e   :  { %v363_v25 = vpop.permute.xlu0 %362 }
 0x52f   :  { %v365_v26 = vmul.f32 %v1900_v10, %v363_v25  ;;  %v456_v28 = vpop.permute.xlu1 %455 }
 0x530   :  { %v458_v30 = vmul.f32 %v1902_v12, %v456_v28 }
 0x531   :  { %v366_v31 = vpack.c.bf16 %v365_v26, %v365_v26 }
 0x532   :  { %v459_v32 = vpack.c.bf16 %v458_v30, %v458_v30 }
 0x533   :  { %461 = vrot.lane.b32.xlu0 %v366_v31, %s2120_s16 }
 0x534   :  { %533 = vrot.lane.b32.xlu1 %v459_v32, %s2130_s4 }
 0x5a5   :  { %v462_v33 = vpop.permute.xlu0 %461 }
 0x5a6   :  { %1716 = vmatmul.mubr.msk.bf16.vlgmr.msra.gmra.mxu0 %vm225_vm3, %v462_v33  ;;  %v534_v34 = vpop.permute.xlu1 %533 }
 0x5a7   :  { %1720 = vmatpush3.bf16.msra.mxu0 %v2244_v41  ;;  %1727 = vmatprep.mubr.msk.bf16.mxu0 %vm2126_vm0, %v2125_v0  ;;  %v536_v35 = vsel %vm225_vm3, %v462_v33, %v534_v34 }
 0x5a8   :  { %1721 = vmatprep.subr.bf16.mxu0 %v2125_v0 }
 0x5ab   :  { %1722 = vmatpush3.bf16.msra.mxu0 %v2250_v42 }
 0x5ac   :  { %1723 = vmatprep.subr.bf16.mxu0 %v2125_v0 }
 0x5af   :  { %1724 = vmatpush3.bf16.msra.mxu0 %v2257_v43 }
 0x5b0   :  { %1725 = vmatprep.subr.bf16.mxu0 %v2125_v0 }
 0x5b3   :  { %1726 = vmatpush3.bf16.msra.mxu0 %v2265_v45 }
 0x5b4   :  { %1751 = vmatprep.subr.bf16.mxu0 %v2125_v0 }
 0x5b6   :  { %1728 = vmatmul.mubr.msk.bf16.vlgmr.msra.gmra.mxu0 %vm392_vm4, %v536_v35 }
 0x5b7   :  { %1752 = vmatpush3.bf16.msra.mxu0 %v2207_v3  ;;  %1755 = vmatprep.mubr.msk.bf16.mxu0 %vm2126_vm0, %v2125_v0 }
 0x5b8   :  { %1753 = vmatprep.subr.bf16.mxu0 %v2125_v0 }
 0x5bb   :  { %1754 = vmatpush3.bf16.msra.mxu0 %v2213_v5 }
 0x5bc   :  { %1759 = vmatprep.subr.bf16.mxu0 %v2125_v0 }
 0x666   :  { %v500_v36 = vpop.f32.mrf.mxu0 }
 0x667   :  { %v506_v37 = vadd.f32 %v500_v36, %v2229_v22 }
 0x668   :  { %v1717_v38 = vpop.f32.mrf.mxu0 }
 0x669   :  { %1907 = vtanh.f32 %v506_v37  ;;  %v1572_v53 = vmul.f32 -1.442695, %v506_v37 }
 0x66a   :  { %v503_v39 = vpop.f32.mrf.mxu0 }
 0x66c   :  { %v1718_v40 = vpop.f32.mrf.mxu0 }
 0x676   :  { %v1908_v44 = vpop.eup %1907  ;;  %v573_v46 = vpop.f32.mrf.mxu0 }
 0x677   :  { %v574_v47 = vadd.f32 %v2288_v52, %v573_v46  ;;  %516 = vrot.lane.b32.xlu0 %v1908_v44, %s2129_s0 }
 0x678   :  { %v1729_v48 = vpop.f32.mrf.mxu0 }
 0x679   :  { %1909 = vtanh.f32 %v574_v47  ;;  %v1574_v54 = vmul.f32 -1.442695, %v574_v47 }
 0x67a   :  { %v576_v49 = vpop.f32.mrf.mxu0  ;;  %1911 = vpow2.f32 %v1572_v53 }
 0x67b   :  { %1913 = vpow2.f32 %v1574_v54 }
 0x67c   :  { %v1730_v50 = vpop.f32.mrf.mxu0 }
 0x686   :  { %v1910_v51 = vpop.eup %1909 }
 0x687   :  { %588 = vrot.lane.b32.xlu1 %v1910_v51, %s2129_s0  ;;  %v1912_v55 = vpop.eup %1911 }
 0x688   :  { %v510_v56 = vadd.f32 1.0, %v1912_v55  ;;  %v1914_v57 = vpop.eup %1913 }
 0x689   :  { %v582_v58 = vadd.f32 1.0, %v1914_v57 }
 0x68a   :  { %1915 = vrcp.f32 %v510_v56 }
 0x68b   :  { %1917 = vrcp.f32 %v582_v58 }
 0x697   :  { %v1916_v59 = vpop.eup %1915 }
 0x698   :  { %v1918_v62 = vpop.eup %1917  ;;  %v514_v2 = vmul.f32 %v1916_v59, %v2296_v19 }
 0x699   :  { %v586_v7 = vmul.f32 %v1918_v62, %v2298_v21  ;;  %v187_v21 = vcombine.high %v2229_v22, %v2229_v22 }
 0x6e9   :  { %v517_v60 = vpop.permute.xlu0 %516 }
 0x6ea   :  { %v519_v61 = vmul.f32 %v1916_v59, %v517_v60 }
 0x6ec   :  { %521 = vrot.lane.b32.xlu0 %v519_v61, %s2129_s0 }
 0x6f9   :  { %v589_v63 = vpop.permute.xlu1 %588 }
 0x6fa   :  { %v591_v1 = vmul.f32 %v1918_v62, %v589_v63 }
 0x6fc   :  { %593 = vrot.lane.b32.xlu1 %v591_v1, %s2129_s0 }
 0x75e   :  { %v522_v4 = vpop.permute.xlu0 %521 }
 0x75f   :  { %v2332_v6 = vadd.f32 %v522_v4, %v514_v2 }
 0x761   :  { %1919 = vtanh.f32 %v2332_v6 }
 0x76e   :  { %v1920_v8 = vpop.eup %1919  ;;  %v594_v9 = vpop.permute.xlu1 %593 }
 0x76f   :  { %v2336_v10 = vadd.f32 %v594_v9, %v586_v7  ;;  %527 = vrot.lane.b32.xlu0 %v1920_v8, %s2129_s0 }
 0x771   :  { %1921 = vtanh.f32 %v2336_v10 }
 0x77e   :  { %v1922_v11 = vpop.eup %1921 }
 0x77f   :  { %599 = vrot.lane.b32.xlu1 %v1922_v11, %s2129_s0 }
 0x7e1   :  { %v528_v12 = vpop.permute.xlu0 %527 }
 0x7e2   :  { %v530_v13 = vmul.f32 %v1916_v59, %v528_v12 }
 0x7e4   :  { %v531_v14 = vpack.c.bf16 %v530_v13, %v530_v13 }
 0x7e6   :  { %605 = vrot.lane.b32.xlu0 %v531_v14, %s2120_s16 }
 0x7f1   :  { %v600_v15 = vpop.permute.xlu1 %599 }
 0x7f2   :  { %v602_v16 = vmul.f32 %v1918_v62, %v600_v15 }
 0x7f4   :  { %v603_v17 = vpack.c.bf16 %v602_v16, %v602_v16 }
 0x7f6   :  { %677 = vrot.lane.b32.xlu1 %v603_v17, %s2130_s4 }
 0x858   :  { %v606_v18 = vpop.permute.xlu0 %605 }
 0x859   :  { %1736 = vmatmul.mubr.msk.bf16.vlgmr.msra.gmra.mxu1 %vm225_vm3, %v606_v18 }
 0x85a   :  { %1740 = vmatpush3.bf16.msra.mxu1 %v2244_v41  ;;  %1747 = vmatprep.mubr.msk.bf16.mxu1 %vm2126_vm0, %v2125_v0 }
 0x85b   :  { %1741 = vmatprep.subr.bf16.mxu1 %v2125_v0 }
 0x85e   :  { %1742 = vmatpush3.bf16.msra.mxu1 %v2250_v42 }
 0x85f   :  { %1743 = vmatprep.subr.bf16.mxu1 %v2125_v0 }
 0x862   :  { %1744 = vmatpush3.bf16.msra.mxu1 %v2257_v43 }
 0x863   :  { %1745 = vmatprep.subr.bf16.mxu1 %v2125_v0 }
 0x866   :  { %1746 = vmatpush3.bf16.msra.mxu1 %v2265_v45 }
 0x867   :  { %1771 = vmatprep.subr.bf16.mxu1 %v2125_v0 }
 0x868   :  { %v678_v19 = vpop.permute.xlu1 %677 }
 0x869   :  { %v680_v20 = vsel %vm225_vm3, %v606_v18, %v678_v19 }
 0x86a   :  { %1748 = vmatmul.mubr.msk.bf16.vlgmr.msra.gmra.mxu1 %vm392_vm4, %v680_v20 }
 0x86b   :  { %1772 = vmatpush3.bf16.msra.mxu1 %v2207_v3  ;;  %1775 = vmatprep.mubr.msk.bf16.mxu1 %vm2126_vm0, %v2125_v0 }
 0x86c   :  { %1773 = vmatprep.subr.bf16.mxu1 %v2125_v0 }
 0x86f   :  { %1774 = vmatpush3.bf16.msra.mxu1 %v2213_v5 }
 0x870   :  { %1779 = vmatprep.subr.bf16.mxu1 %v2125_v0 }
 0x919   :  { %v644_v23 = vpop.f32.mrf.mxu1 }
 0x91a   :  { %v650_v24 = vadd.f32 %v644_v23, %v187_v21 }
 0x91b   :  { %v1737_v25 = vpop.f32.mrf.mxu1 }
 0x91c   :  { %1923 = vtanh.f32 %v650_v24  ;;  %v1576_v22 = vmul.f32 -1.442695, %v650_v24 }
 0x91d   :  { %v647_v26 = vpop.f32.mrf.mxu1 }
 0x91f   :  { %v1738_v28 = vpop.f32.mrf.mxu1 }
 0x929   :  { %v1924_v30 = vpop.eup %1923 }
 0x92a   :  { %v717_v31 = vpop.f32.mrf.mxu1  ;;  %660 = vrot.lane.b32.xlu0 %v1924_v30, %s2129_s0 }
 0x92b   :  { %v718_v32 = vadd.f32 %v2288_v52, %v717_v31 }
 0x92c   :  { %v1749_v33 = vpop.f32.mrf.mxu1 }
 0x92d   :  { %1925 = vtanh.f32 %v718_v32  ;;  %v1578_v38 = vmul.f32 -1.442695, %v718_v32 }
 0x92e   :  { %v720_v34 = vpop.f32.mrf.mxu1  ;;  %1927 = vpow2.f32 %v1576_v22 }
 0x92f   :  { %1929 = vpow2.f32 %v1578_v38 }
 0x930   :  { %v1750_v35 = vpop.f32.mrf.mxu1 }
 0x93a   :  { %v1926_v36 = vpop.eup %1925 }
 0x93b   :  { %732 = vrot.lane.b32.xlu1 %v1926_v36, %s2129_s0  ;;  %v1928_v37 = vpop.eup %1927 }
 0x93c   :  { %v654_v39 = vadd.f32 1.0, %v1928_v37  ;;  %v1930_v40 = vpop.eup %1929 }
 0x93d   :  { %v726_v46 = vadd.f32 1.0, %v1930_v40 }
 0x93e   :  { %1931 = vrcp.f32 %v654_v39 }
 0x93f   :  { %1933 = vrcp.f32 %v726_v46 }
 0x94b   :  { %v1932_v44 = vpop.eup %1931 }
 0x94c   :  { %v1934_v49 = vpop.eup %1933  ;;  %v658_v53 = vmul.f32 %v1932_v44, %v2332_v6 }
 0x94d   :  { %v730_v57 = vmul.f32 %v1934_v49, %v2336_v10 }
 0x99c   :  { %v661_v47 = vpop.permute.xlu0 %660 }
 0x99d   :  { %v663_v48 = vmul.f32 %v1932_v44, %v661_v47 }
 0x99f   :  { %665 = vrot.lane.b32.xlu0 %v663_v48, %s2129_s0 }
 0x9ad   :  { %v733_v50 = vpop.permute.xlu1 %732 }
 0x9ae   :  { %v735_v51 = vmul.f32 %v1934_v49, %v733_v50 }
 0x9b0   :  { %737 = vrot.lane.b32.xlu1 %v735_v51, %s2129_s0 }
 0xa11   :  { %v666_v54 = vpop.permute.xlu0 %665 }
 0xa12   :  { %v2370_v55 = vadd.f32 %v666_v54, %v658_v53 }
 0xa14   :  { %1935 = vtanh.f32 %v2370_v55 }
 0xa21   :  { %v1936_v56 = vpop.eup %1935 }
 0xa22   :  { %v738_v58 = vpop.permute.xlu1 %737  ;;  %671 = vrot.lane.b32.xlu0 %v1936_v56, %s2129_s0 }
 0xa23   :  { %v2375_v59 = vadd.f32 %v738_v58, %v730_v57  ;;  %v203_v57 = vcombine.high %v2232_v27, %v2232_v27 }
 0xa25   :  { %1937 = vtanh.f32 %v2375_v59 }
 0xa32   :  { %v1938_v60 = vpop.eup %1937 }
 0xa33   :  { %743 = vrot.lane.b32.xlu1 %v1938_v60, %s2129_s0 }
 0xa94   :  { %v672_v61 = vpop.permute.xlu0 %671 }
 0xa95   :  { %v674_v62 = vmul.f32 %v1932_v44, %v672_v61 }
 0xa97   :  { %v675_v63 = vpack.c.bf16 %v674_v62, %v674_v62 }
 0xa99   :  { %749 = vrot.lane.b32.xlu0 %v675_v63, %s2120_s16 }
 0xaa5   :  { %v744_v1 = vpop.permute.xlu1 %743 }
 0xaa6   :  { %v746_v2 = vmul.f32 %v1934_v49, %v744_v1 }
 0xaa8   :  { %v747_v4 = vpack.c.bf16 %v746_v2, %v746_v2 }
 0xaaa   :  { %821 = vrot.lane.b32.xlu1 %v747_v4, %s2130_s4 }
 0xb0b   :  { %v750_v6 = vpop.permute.xlu0 %749 }
 0xb0c   :  { %1756 = vmatmul.mubr.msk.bf16.vlgmr.msra.gmra.mxu0 %vm225_vm3, %v750_v6 }
 0xb0d   :  { %1760 = vmatpush3.bf16.msra.mxu0 %v2244_v41  ;;  %1767 = vmatprep.mubr.msk.bf16.mxu0 %vm2126_vm0, %v2125_v0 }
 0xb0e   :  { %1761 = vmatprep.subr.bf16.mxu0 %v2125_v0 }
 0xb11   :  { %1762 = vmatpush3.bf16.msra.mxu0 %v2250_v42 }
 0xb12   :  { %1763 = vmatprep.subr.bf16.mxu0 %v2125_v0 }
 0xb15   :  { %1764 = vmatpush3.bf16.msra.mxu0 %v2257_v43 }
 0xb16   :  { %1765 = vmatprep.subr.bf16.mxu0 %v2125_v0 }
 0xb19   :  { %1766 = vmatpush3.bf16.msra.mxu0 %v2265_v45 }
 0xb1a   :  { %1791 = vmatprep.subr.bf16.mxu0 %v2125_v0 }
 0xb1c   :  { %v822_v7 = vpop.permute.xlu1 %821 }
 0xb1d   :  { %v824_v8 = vsel %vm225_vm3, %v750_v6, %v822_v7 }
 0xb1e   :  { %1768 = vmatmul.mubr.msk.bf16.vlgmr.msra.gmra.mxu0 %vm392_vm4, %v824_v8 }
 0xb1f   :  { %1792 = vmatpush3.bf16.msra.mxu0 %v2207_v3  ;;  %1795 = vmatprep.mubr.msk.bf16.mxu0 %vm2126_vm0, %v2125_v0 }
 0xb20   :  { %1793 = vmatprep.subr.bf16.mxu0 %v2125_v0 }
 0xb23   :  { %1794 = vmatpush3.bf16.msra.mxu0 %v2213_v5 }
 0xb24   :  { %1799 = vmatprep.subr.bf16.mxu0 %v2125_v0 }
 0xbcc   :  { %v788_v9 = vpop.f32.mrf.mxu0 }
 0xbcd   :  { %v794_v10 = vadd.f32 %v788_v9, %v2232_v27 }
 0xbce   :  { %v1757_v11 = vpop.f32.mrf.mxu0 }
 0xbcf   :  { %1939 = vtanh.f32 %v794_v10  ;;  %v1580_v21 = vmul.f32 -1.442695, %v794_v10 }
 0xbd0   :  { %v791_v12 = vpop.f32.mrf.mxu0 }
 0xbd2   :  { %v1758_v13 = vpop.f32.mrf.mxu0 }
 0xbdc   :  { %v1940_v14 = vpop.eup %1939 }
 0xbdd   :  { %804 = vrot.lane.b32.xlu0 %v1940_v14, %s2129_s0 }
 0xbde   :  { %v861_v15 = vpop.f32.mrf.mxu0 }
 0xbdf   :  { %v862_v16 = vadd.f32 %v2288_v52, %v861_v15 }
 0xbe0   :  { %v1769_v17 = vpop.f32.mrf.mxu0 }
 0xbe1   :  { %1941 = vtanh.f32 %v862_v16  ;;  %v1582_v24 = vmul.f32 -1.442695, %v862_v16 }
 0xbe2   :  { %v864_v18 = vpop.f32.mrf.mxu0  ;;  %1943 = vpow2.f32 %v1580_v21 }
 0xbe3   :  { %1945 = vpow2.f32 %v1582_v24 }
 0xbe4   :  { %v1770_v19 = vpop.f32.mrf.mxu0 }
 0xbee   :  { %v1942_v20 = vpop.eup %1941 }
 0xbef   :  { %876 = vrot.lane.b32.xlu1 %v1942_v20, %s2129_s0  ;;  %v1944_v23 = vpop.eup %1943 }
 0xbf0   :  { %v798_v25 = vadd.f32 1.0, %v1944_v23  ;;  %v1946_v26 = vpop.eup %1945 }
 0xbf1   :  { %v870_v32 = vadd.f32 1.0, %v1946_v26 }
 0xbf2   :  { %1947 = vrcp.f32 %v798_v25 }
 0xbf3   :  { %1949 = vrcp.f32 %v870_v32 }
 0xbff   :  { %v1948_v28 = vpop.eup %1947 }
 0xc00   :  { %v1950_v33 = vpop.eup %1949  ;;  %v802_v36 = vmul.f32 %v1948_v28, %v2370_v55 }
 0xc01   :  { %v874_v39 = vmul.f32 %v1950_v33, %v2375_v59 }
 0xc4f   :  { %v805_v30 = vpop.permute.xlu0 %804 }
 0xc50   :  { %v807_v31 = vmul.f32 %v1948_v28, %v805_v30 }
 0xc52   :  { %809 = vrot.lane.b32.xlu0 %v807_v31, %s2129_s0 }
 0xc61   :  { %v877_v34 = vpop.permute.xlu1 %876 }
 0xc62   :  { %v879_v35 = vmul.f32 %v1950_v33, %v877_v34 }
 0xc64   :  { %881 = vrot.lane.b32.xlu1 %v879_v35, %s2129_s0 }
 0xcc4   :  { %v810_v22 = vpop.permute.xlu0 %809 }
 0xcc5   :  { %v2407_v37 = vadd.f32 %v810_v22, %v802_v36 }
 0xcc7   :  { %1951 = vtanh.f32 %v2407_v37 }
 0xcd4   :  { %v1952_v38 = vpop.eup %1951 }
 0xcd5   :  { %815 = vrot.lane.b32.xlu0 %v1952_v38, %s2129_s0 }
 0xcd6   :  { %v882_v40 = vpop.permute.xlu1 %881 }
 0xcd7   :  { %v2412_v44 = vadd.f32 %v882_v40, %v874_v39 }
 0xcd9   :  { %1953 = vtanh.f32 %v2412_v44 }
 0xce6   :  { %v1954_v46 = vpop.eup %1953 }
 0xce7   :  { %887 = vrot.lane.b32.xlu1 %v1954_v46, %s2129_s0 }
 0xd47   :  { %v816_v47 = vpop.permute.xlu0 %815 }
 0xd48   :  { %v818_v48 = vmul.f32 %v1948_v28, %v816_v47 }
 0xd4a   :  { %v819_v49 = vpack.c.bf16 %v818_v48, %v818_v48 }
 0xd4c   :  { %893 = vrot.lane.b32.xlu0 %v819_v49, %s2120_s16 }
 0xd59   :  { %v888_v50 = vpop.permute.xlu1 %887 }
 0xd5a   :  { %v890_v51 = vmul.f32 %v1950_v33, %v888_v50 }
 0xd5c   :  { %v891_v53 = vpack.c.bf16 %v890_v51, %v890_v51 }
 0xd5e   :  { %965 = vrot.lane.b32.xlu1 %v891_v53, %s2130_s4 }
 0xdbe   :  { %v894_v54 = vpop.permute.xlu0 %893 }
 0xdbf   :  { %1776 = vmatmul.mubr.msk.bf16.vlgmr.msra.gmra.mxu1 %vm225_vm3, %v894_v54 }
 0xdc0   :  { %1780 = vmatpush3.bf16.msra.mxu1 %v2244_v41  ;;  %1787 = vmatprep.mubr.msk.bf16.mxu1 %vm2126_vm0, %v2125_v0 }
 0xdc1   :  { %1781 = vmatprep.subr.bf16.mxu1 %v2125_v0 }
 0xdc4   :  { %1782 = vmatpush3.bf16.msra.mxu1 %v2250_v42 }
 0xdc5   :  { %1783 = vmatprep.subr.bf16.mxu1 %v2125_v0 }
 0xdc8   :  { %1784 = vmatpush3.bf16.msra.mxu1 %v2257_v43 }
 0xdc9   :  { %1785 = vmatprep.subr.bf16.mxu1 %v2125_v0 }
 0xdcc   :  { %1786 = vmatpush3.bf16.msra.mxu1 %v2265_v45 }
 0xdcd   :  { %1811 = vmatprep.subr.bf16.mxu1 %v2125_v0 }
 0xdd0   :  { %v966_v55 = vpop.permute.xlu1 %965 }
 0xdd1   :  { %v968_v56 = vsel %vm225_vm3, %v894_v54, %v966_v55 }
 0xdd2   :  { %1788 = vmatmul.mubr.msk.bf16.vlgmr.msra.gmra.mxu1 %vm392_vm4, %v968_v56 }
 0xdd3   :  { %1812 = vmatpush3.bf16.msra.mxu1 %v2207_v3  ;;  %1815 = vmatprep.mubr.msk.bf16.mxu1 %vm2126_vm0, %v2125_v0 }
 0xdd4   :  { %1813 = vmatprep.subr.bf16.mxu1 %v2125_v0 }
 0xdd7   :  { %1814 = vmatpush3.bf16.msra.mxu1 %v2213_v5 }
 0xdd8   :  { %1819 = vmatprep.subr.bf16.mxu1 %v2125_v0 }
 0xe7f   :  { %v932_v58 = vpop.f32.mrf.mxu1 }
 0xe80   :  { %v938_v59 = vadd.f32 %v932_v58, %v203_v57 }
 0xe81   :  { %v1777_v60 = vpop.f32.mrf.mxu1 }
 0xe82   :  { %1955 = vtanh.f32 %v938_v59  ;;  %v1584_v27 = vmul.f32 -1.442695, %v938_v59 }
 0xe83   :  { %v935_v61 = vpop.f32.mrf.mxu1 }
 0xe85   :  { %v1778_v62 = vpop.f32.mrf.mxu1 }
 0xe8f   :  { %v1956_v63 = vpop.eup %1955 }
 0xe90   :  { %948 = vrot.lane.b32.xlu0 %v1956_v63, %s2129_s0 }
 0xe92   :  { %v1005_v3 = vpop.f32.mrf.mxu1 }
 0xe93   :  { %v1006_v1 = vadd.f32 %v2288_v52, %v1005_v3 }
 0xe94   :  { %v1789_v2 = vpop.f32.mrf.mxu1 }
 0xe95   :  { %1957 = vtanh.f32 %v1006_v1  ;;  %v1586_v9 = vmul.f32 -1.442695, %v1006_v1 }
 0xe96   :  { %v1008_v5 = vpop.f32.mrf.mxu1  ;;  %1959 = vpow2.f32 %v1584_v27 }
 0xe98   :  { %v1790_v4 = vpop.f32.mrf.mxu1 }
 0xea2   :  { %v1958_v6 = vpop.eup %1957 }
 0xea3   :  { %1020 = vrot.lane.b32.xlu1 %v1958_v6, %s2129_s0  ;;  %v1960_v7 = vpop.eup %1959 }
 0xea4   :  { %v942_v8 = vadd.f32 1.0, %v1960_v7 }
 0xea6   :  { %1961 = vrcp.f32 %v942_v8 }
 0xea7   :  { %1963 = vpow2.f32 %v1586_v9 }
 0xeb3   :  { %v1962_v10 = vpop.eup %1961 }
 0xeb4   :  { %v1964_v11 = vpop.eup %1963  ;;  %v946_v18 = vmul.f32 %v1962_v10, %v2407_v37 }
 0xeb5   :  { %v1014_v14 = vadd.f32 1.0, %v1964_v11 }
 0xeb7   :  { %1965 = vrcp.f32 %v1014_v14 }
 0xec4   :  { %v1966_v15 = vpop.eup %1965 }
 0xec5   :  { %v1018_v23 = vmul.f32 %v1966_v15, %v2412_v44 }
 0xf02   :  { %v949_v12 = vpop.permute.xlu0 %948 }
 0xf03   :  { %v951_v13 = vmul.f32 %v1962_v10, %v949_v12 }
 0xf05   :  { %953 = vrot.lane.b32.xlu0 %v951_v13, %s2129_s0 }
 0xf15   :  { %v1021_v16 = vpop.permute.xlu1 %1020 }
 0xf16   :  { %v1023_v17 = vmul.f32 %v1966_v15, %v1021_v16 }
 0xf18   :  { %1025 = vrot.lane.b32.xlu1 %v1023_v17, %s2129_s0 }
 0xf77   :  { %v954_v19 = vpop.permute.xlu0 %953 }
 0xf78   :  { %v2445_v20 = vadd.f32 %v954_v19, %v946_v18 }
 0xf7a   :  { %1967 = vtanh.f32 %v2445_v20 }
 0xf87   :  { %v1968_v21 = vpop.eup %1967 }
 0xf88   :  { %959 = vrot.lane.b32.xlu0 %v1968_v21, %s2129_s0 }
 0xf8a   :  { %v1026_v24 = vpop.permute.xlu1 %1025 }
 0xf8b   :  { %v2450_v25 = vadd.f32 %v1026_v24, %v1018_v23 }
 0xf8d   :  { %1969 = vtanh.f32 %v2450_v25 }
 0xf9a   :  { %v1970_v26 = vpop.eup %1969 }
 0xf9b   :  { %1031 = vrot.lane.b32.xlu1 %v1970_v26, %s2129_s0 }
 0xffa   :  { %v960_v28 = vpop.permute.xlu0 %959 }
 0xffb   :  { %v962_v30 = vmul.f32 %v1962_v10, %v960_v28 }
 0xffd   :  { %v963_v31 = vpack.c.bf16 %v962_v30, %v962_v30 }
 0xfff   :  { %1037 = vrot.lane.b32.xlu0 %v963_v31, %s2120_s16 }
0x100d   :  { %v1032_v32 = vpop.permute.xlu1 %1031 }
0x100e   :  { %v1034_v33 = vmul.f32 %v1966_v15, %v1032_v32 }
0x1010   :  { %v1035_v34 = vpack.c.bf16 %v1034_v33, %v1034_v33 }
0x1012   :  { %1109 = vrot.lane.b32.xlu1 %v1035_v34, %s2130_s4 }
0x1071   :  { %v1038_v35 = vpop.permute.xlu0 %1037 }
0x1072   :  { %1796 = vmatmul.mubr.msk.bf16.vlgmr.msra.gmra.mxu0 %vm225_vm3, %v1038_v35 }
0x1073   :  { %1800 = vmatpush3.bf16.msra.mxu0 %v2244_v41  ;;  %1807 = vmatprep.mubr.msk.bf16.mxu0 %vm2126_vm0, %v2125_v0 }
0x1074   :  { %1801 = vmatprep.subr.bf16.mxu0 %v2125_v0 }
0x1077   :  { %1802 = vmatpush3.bf16.msra.mxu0 %v2250_v42 }
0x1078   :  { %1803 = vmatprep.subr.bf16.mxu0 %v2125_v0 }
0x107b   :  { %1804 = vmatpush3.bf16.msra.mxu0 %v2257_v43 }
0x107c   :  { %1805 = vmatprep.subr.bf16.mxu0 %v2125_v0 }
0x107f   :  { %1806 = vmatpush3.bf16.msra.mxu0 %v2265_v45 }
0x1080   :  { %1831 = vmatprep.subr.bf16.mxu0 %v2125_v0 }
0x1084   :  { %v1110_v36 = vpop.permute.xlu1 %1109 }
0x1085   :  { %v1112_v22 = vsel %vm225_vm3, %v1038_v35, %v1110_v36 }
0x1086   :  { %1808 = vmatmul.mubr.msk.bf16.vlgmr.msra.gmra.mxu0 %vm392_vm4, %v1112_v22 }
0x1087   :  { %1832 = vmatpush3.bf16.msra.mxu0 %v2244_v41  ;;  %1839 = vmatprep.mubr.msk.bf16.mxu0 %vm2126_vm0, %v2125_v0 }
0x1088   :  { %1833 = vmatprep.subr.bf16.mxu0 %v2125_v0 }
0x108b   :  { %1834 = vmatpush3.bf16.msra.mxu0 %v2250_v42 }
0x108c   :  { %1835 = vmatprep.subr.bf16.mxu0 %v2125_v0 }
0x108f   :  { %1836 = vmatpush3.bf16.msra.mxu0 %v2257_v43 }
0x1090   :  { %1837 = vmatprep.subr.bf16.mxu0 %v2125_v0 }
0x1093   :  { %1838 = vmatpush3.bf16.msra.mxu0 %v2265_v45 }
0x1094   :  { %1851 = vmatprep.subr.bf16.mxu0 %v2125_v0 }
0x1132   :  { %v1076_v37 = vpop.f32.mrf.mxu0 }
0x1133   :  { %v1082_v38 = vadd.f32 %v1076_v37, %v2234_v29 }
0x1134   :  { %v1797_v39 = vpop.f32.mrf.mxu0 }
0x1135   :  { %1971 = vtanh.f32 %v1082_v38  ;;  %v1588_v54 = vmul.f32 -1.442695, %v1082_v38 }
0x1136   :  { %v1079_v40 = vpop.f32.mrf.mxu0 }
0x1138   :  { %v1798_v44 = vpop.f32.mrf.mxu0 }
0x1142   :  { %v1972_v46 = vpop.eup %1971 }
0x1143   :  { %1092 = vrot.lane.b32.xlu0 %v1972_v46, %s2129_s0 }
0x1146   :  { %v1149_v47 = vpop.f32.mrf.mxu0 }
0x1147   :  { %v1150_v48 = vadd.f32 %v2288_v52, %v1149_v47 }
0x1148   :  { %v1809_v49 = vpop.f32.mrf.mxu0 }
0x1149   :  { %1973 = vtanh.f32 %v1150_v48  ;;  %v1590_v57 = vmul.f32 -1.442695, %v1150_v48 }
0x114a   :  { %v1152_v50 = vpop.f32.mrf.mxu0  ;;  %1975 = vpow2.f32 %v1588_v54 }
0x114c   :  { %v1810_v51 = vpop.f32.mrf.mxu0 }
0x1156   :  { %v1974_v53 = vpop.eup %1973 }
0x1157   :  { %1164 = vrot.lane.b32.xlu1 %v1974_v53, %s2129_s0  ;;  %v1976_v55 = vpop.eup %1975 }
0x1158   :  { %v1086_v56 = vadd.f32 1.0, %v1976_v55 }
0x115a   :  { %1977 = vrcp.f32 %v1086_v56 }
0x115b   :  { %1979 = vpow2.f32 %v1590_v57 }
0x1167   :  { %v1978_v58 = vpop.eup %1977 }
0x1168   :  { %v1980_v60 = vpop.eup %1979  ;;  %v1090_v2 = vmul.f32 %v1978_v58, %v2445_v20 }
0x1169   :  { %v1158_v62 = vadd.f32 1.0, %v1980_v60 }
0x116b   :  { %1981 = vrcp.f32 %v1158_v62 }
0x1178   :  { %v1982_v63 = vpop.eup %1981 }
0x1179   :  { %v1162_v27 = vmul.f32 %v1982_v63, %v2450_v25 }
0x11b5   :  { %v1093_v59 = vpop.permute.xlu0 %1092 }
0x11b6   :  { %v1095_v61 = vmul.f32 %v1978_v58, %v1093_v59 }
0x11b8   :  { %1097 = vrot.lane.b32.xlu0 %v1095_v61, %s2129_s0 }
0x11c9   :  { %v1165_v3 = vpop.permute.xlu1 %1164 }
0x11ca   :  { %v1167_v1 = vmul.f32 %v1982_v63, %v1165_v3 }
0x11cc   :  { %1169 = vrot.lane.b32.xlu1 %v1167_v1, %s2129_s0 }
0x122a   :  { %v1098_v5 = vpop.permute.xlu0 %1097 }
0x122b   :  { %v2486_v4 = vadd.f32 %v1098_v5, %v1090_v2 }
0x122d   :  { %1983 = vtanh.f32 %v2486_v4 }
0x123a   :  { %v1984_v6 = vpop.eup %1983 }
0x123b   :  { %1103 = vrot.lane.b32.xlu0 %v1984_v6, %s2129_s0 }
0x123e   :  { %v1170_v7 = vpop.permute.xlu1 %1169 }
0x123f   :  { %v2491_v8 = vadd.f32 %v1170_v7, %v1162_v27 }
0x1241   :  { %1985 = vtanh.f32 %v2491_v8 }
0x124e   :  { %v1986_v9 = vpop.eup %1985 }
0x124f   :  { %1175 = vrot.lane.b32.xlu1 %v1986_v9, %s2129_s0 }
0x12ad   :  { %v1104_v10 = vpop.permute.xlu0 %1103 }
0x12ae   :  { %v1106_v11 = vmul.f32 %v1978_v58, %v1104_v10 }
0x12b0   :  { %v1107_v12 = vpack.c.bf16 %v1106_v11, %v1106_v11 }
0x12b2   :  { %1181 = vrot.lane.b32.xlu0 %v1107_v12, %s2120_s16 }
0x12c1   :  { %v1176_v13 = vpop.permute.xlu1 %1175 }
0x12c2   :  { %v1178_v14 = vmul.f32 %v1982_v63, %v1176_v13  ;;  %v1879_v13 = vld [vmem:[%s2565_s6 + $0x8] sm:$0xff]  }
0x12c4   :  { %v1179_v15 = vpack.c.bf16 %v1178_v14, %v1178_v14  ;;  %v1880_v14 = vld [vmem:[%s2565_s6] sm:$0xff]  }
0x12c6   :  { %1253 = vrot.lane.b32.xlu1 %v1179_v15, %s2130_s4 }
0x1324   :  { %v1182_v16 = vpop.permute.xlu0 %1181 }
0x1325   :  { %1816 = vmatmul.mubr.msk.bf16.vlgmr.msra.gmra.mxu1 %vm225_vm3, %v1182_v16 }
0x1326   :  { %1820 = vmatpush3.bf16.msra.mxu1 %v2244_v41  ;;  %1827 = vmatprep.mubr.msk.bf16.mxu1 %vm2126_vm0, %v2125_v0 }
0x1327   :  { %1821 = vmatprep.subr.bf16.mxu1 %v2125_v0 }
0x132a   :  { %1822 = vmatpush3.bf16.msra.mxu1 %v2250_v42  ;;  %v204_v42 = vcombine.high %v2234_v29, %v2234_v29 }
0x132b   :  { %1823 = vmatprep.subr.bf16.mxu1 %v2125_v0 }
0x132e   :  { %1824 = vmatpush3.bf16.msra.mxu1 %v2257_v43 }
0x132f   :  { %1825 = vmatprep.subr.bf16.mxu1 %v2125_v0 }
0x1332   :  { %1826 = vmatpush3.bf16.msra.mxu1 %v2265_v45 }
0x1333   :  { %1843 = vmatprep.subr.bf16.mxu1 %v2125_v0 }
0x1338   :  { %v1254_v17 = vpop.permute.xlu1 %1253 }
0x1339   :  { %v1256_v41 = vsel %vm225_vm3, %v1182_v16, %v1254_v17  ;;  %v1881_v16 = vld [vmem:[%s2567_s8 + $0x8] sm:$0xff]  }
0x133a   :  { %1828 = vmatmul.mubr.msk.bf16.vlgmr.msra.gmra.mxu1 %vm392_vm4, %v1256_v41 }
0x133b   :  { %1847 = vmatprep.mubr.msk.bf16.mxu1 %vm2126_vm0, %v2125_v0  ;;  %1844 = vmatpush3.bf16.msra.mxu1 %v1879_v13 }
0x133c   :  { %1845 = vmatprep.subr.bf16.mxu1 %v2125_v0 }
0x133f   :  { %1846 = vmatpush3.bf16.msra.mxu1 %v1880_v14 }
0x13e5   :  { %v1220_v18 = vpop.f32.mrf.mxu1 }
0x13e6   :  { %v1226_v19 = vadd.f32 %v1220_v18, %v204_v42 }
0x13e7   :  { %v1817_v43 = vpop.f32.mrf.mxu1 }
0x13e8   :  { %1987 = vtanh.f32 %v1226_v19  ;;  %v1592_v29 = vmul.f32 -1.442695, %v1226_v19  ;;  %v1882_v19 = vld [vmem:[%s2567_s8] sm:$0xff]   ;;  %s1545_s8 = sshll.u32 %s2131_s13, 4  ;;  %s1546_s8 = int_to_ptr.vmem [resolvable:$true] %s1545_s8 }
0x13e9   :  { %v1223_v20 = vpop.f32.mrf.mxu1  ;;  %v1597_v43 = vld [vmem:[%s2566_s7] ss:$0 sm:$0xff]  ;;  %s2091_s7 = scalar_lea.vmem %s1546_s8, 32  ;;  %p2096_p7 = scmp.lt.s32.totalorder %s1546_s8, %s1546_s8 }
0x13ea   :  { %p2092_p6 = scmp.ne.s32.totalorder %s1546_s8, %s2091_s7  ;;  %p2097_p8 = scmp.lt.s32.totalorder %s2091_s7, %s2091_s7 }
0x13eb   :  { %v1818_v21 = vpop.f32.mrf.mxu1 }
0x13ec   :  { %p2098_p9 = por %p2097_p8, %p2096_p7 }
0x13ee   :  { %p2099_p10 = pnand %p2098_p9, %p2092_p6 }
0x13f5   :  { %v1988_v45 = vpop.eup %1987 }
0x13f6   :  { %1236 = vrot.lane.b32.xlu0 %v1988_v45, %s2129_s0 }
0x13fa   :  { %v1293_v23 = vpop.f32.mrf.mxu1 }
0x13fb   :  { %v1294_v24 = vadd.f32 %v2288_v52, %v1293_v23 }
0x13fc   :  { %v1829_v25 = vpop.f32.mrf.mxu1 }
0x13fd   :  { %1989 = vtanh.f32 %v1294_v24  ;;  %v1594_v33 = vmul.f32 -1.442695, %v1294_v24 }
0x13fe   :  { %v1296_v26 = vpop.f32.mrf.mxu1  ;;  %1991 = vpow2.f32 %v1592_v29 }
0x13ff   :  { %v1601_v26 = vld [vmem:[%s2568_s9] ss:$0 sm:$0xff] }
0x1400   :  { %v1830_v28 = vpop.f32.mrf.mxu1 }
0x140a   :  { %v1990_v30 = vpop.eup %1989 }
0x140b   :  { %1308 = vrot.lane.b32.xlu1 %v1990_v30, %s2129_s0  ;;  %v1992_v31 = vpop.eup %1991 }
0x140c   :  { %v1230_v32 = vadd.f32 1.0, %v1992_v31 }
0x140e   :  { %1993 = vrcp.f32 %v1230_v32 }
0x140f   :  { %1995 = vpow2.f32 %v1594_v33 }
0x141b   :  { %v1994_v34 = vpop.eup %1993 }
0x141c   :  { %v1996_v22 = vpop.eup %1995  ;;  %v1234_v44 = vmul.f32 %v1994_v34, %v2486_v4 }
0x141d   :  { %v1302_v37 = vadd.f32 1.0, %v1996_v22 }
0x141f   :  { %1997 = vrcp.f32 %v1302_v37 }
0x142c   :  { %v1998_v38 = vpop.eup %1997 }
0x142d   :  { %v1306_v49 = vmul.f32 %v1998_v38, %v2491_v8 }
0x1468   :  { %v1237_v35 = vpop.permute.xlu0 %1236 }
0x1469   :  { %v1239_v36 = vmul.f32 %v1994_v34, %v1237_v35 }
0x146b   :  { %1241 = vrot.lane.b32.xlu0 %v1239_v36, %s2129_s0 }
0x147d   :  { %v1309_v39 = vpop.permute.xlu1 %1308 }
0x147e   :  { %v1311_v40 = vmul.f32 %v1998_v38, %v1309_v39 }
0x1480   :  { %1313 = vrot.lane.b32.xlu1 %v1311_v40, %s2129_s0 }
0x14dd   :  { %v1242_v46 = vpop.permute.xlu0 %1241 }
0x14de   :  { %v1244_v47 = vadd.f32 %v1242_v46, %v1234_v44 }
0x14e0   :  { %1999 = vtanh.f32 %v1244_v47 }
0x14ed   :  { %v2000_v48 = vpop.eup %1999 }
0x14ee   :  { %1247 = vrot.lane.b32.xlu0 %v2000_v48, %s2129_s0 }
0x14f2   :  { %v1314_v50 = vpop.permute.xlu1 %1313 }
0x14f3   :  { %v1316_v51 = vadd.f32 %v1314_v50, %v1306_v49 }
0x14f5   :  { %2001 = vtanh.f32 %v1316_v51 }
0x1502   :  { %v2002_v53 = vpop.eup %2001 }
0x1503   :  { %1319 = vrot.lane.b32.xlu1 %v2002_v53, %s2129_s0 }
0x1560   :  { %v1248_v54 = vpop.permute.xlu0 %1247 }
0x1561   :  { %v1250_v55 = vmul.f32 %v1994_v34, %v1248_v54 }
0x1563   :  { %v1251_v56 = vpack.c.bf16 %v1250_v55, %v1250_v55 }
0x1565   :  { %1325 = vrot.lane.b32.xlu0 %v1251_v56, %s2120_s16 }
0x1575   :  { %v1320_v57 = vpop.permute.xlu1 %1319 }
0x1576   :  { %v1322_v58 = vmul.f32 %v1998_v38, %v1320_v57 }
0x1578   :  { %v1323_v59 = vpack.c.bf16 %v1322_v58, %v1322_v58 }
0x157a   :  { %1328 = vrot.lane.b32.xlu1 %v1323_v59, %s2130_s4 }
0x15d7   :  { %v1326_v60 = vpop.permute.xlu0 %1325 }
0x15ec   :  { %v1329_v61 = vpop.permute.xlu1 %1328 }
0x15ed   :  { %v1332_v62 = vsel %vm225_vm3, %v1326_v60, %v1329_v61 }
0x15ee   :  { %1840 = vmatmul.mubr.msk.bf16.vlgmr.msra.gmra.mxu0 %vm392_vm4, %v1332_v62 }
0x15ef   :  { %1855 = vmatprep.mubr.msk.bf16.mxu0 %vm2126_vm0, %v2125_v0  ;;  %1852 = vmatpush3.bf16.msra.mxu0 %v1881_v16 }
0x15f0   :  { %1853 = vmatprep.subr.bf16.mxu0 %v2125_v0 }
0x15f3   :  { %1854 = vmatpush3.bf16.msra.mxu0 %v1882_v19 }
0x16ae   :  { %v1369_v63 = vpop.f32.mrf.mxu0 }
0x16af   :  { %v1370_v3 = vadd.f32 %v2288_v52, %v1369_v63 }
0x16b0   :  { %v1841_v1 = vpop.f32.mrf.mxu0 }
0x16b1   :  { %2003 = vtanh.f32 %v1370_v3  ;;  %v1596_v6 = vmul.f32 -1.442695, %v1370_v3 }
0x16b2   :  { %v1372_v2 = vpop.f32.mrf.mxu0 }
0x16b3   :  { %2005 = vpow2.f32 %v1596_v6 }
0x16b4   :  { %v1842_v5 = vpop.f32.mrf.mxu0 }
0x16be   :  { %v2004_v4 = vpop.eup %2003 }
0x16bf   :  { %1384 = vrot.lane.b32.xlu0 %v2004_v4, %s2129_s0 }
0x16c0   :  { %v2006_v27 = vpop.eup %2005 }
0x16c1   :  { %v1378_v7 = vadd.f32 1.0, %v2006_v27 }
0x16c3   :  { %2007 = vrcp.f32 %v1378_v7 }
0x16d0   :  { %v2008_v8 = vpop.eup %2007 }
0x16d1   :  { %v1382_v11 = vmul.f32 %v2008_v8, %v1316_v51 }
0x1731   :  { %v1385_v9 = vpop.permute.xlu0 %1384 }
0x1732   :  { %v1387_v10 = vmul.f32 %v2008_v8, %v1385_v9 }
0x1734   :  { %1389 = vrot.lane.b32.xlu1 %v1387_v10, %s2129_s0 }
0x17a6   :  { %v1390_v12 = vpop.permute.xlu1 %1389 }
0x17a7   :  { %v1392_v52 = vadd.f32 %v1390_v12, %v1382_v11 }
0x17a9   :  { %2009 = vtanh.f32 %v1392_v52 }
0x17b6   :  { %v2010_v15 = vpop.eup %2009 }
0x17b7   :  { %1395 = vrot.lane.b32.xlu0 %v2010_v15, %s2129_s0 }
0x1829   :  { %v1396_v17 = vpop.permute.xlu0 %1395 }
0x182a   :  { %v1398_v41 = vmul.f32 %v2008_v8, %v1396_v17 }
0x182c   :  { %v1399_v42 = vpack.c.bf16 %v1398_v41, %v1398_v41 }
0x182e   :  { %1412 = vrot.lane.b32.xlu1 %v1399_v42, %s2120_s16 }
0x18a0   :  { %v1413_v18 = vpop.permute.xlu1 %1412 }
0x18a1   :  { %1848 = vmatmul.mubr.msk.bf16.vlgmr.msra.gmra.mxu1 %vm225_vm3, %v1413_v18 }
0x1961   :  { %v1463_v20 = vpop.f32.mrf.mxu1 }
0x1962   :  { %v1464_v21 = vadd.f32 %v1597_v43, %v1463_v20 }
0x1963   :  { %v1849_v0 = vpop.f32.mrf.mxu1 }
0x1964   :  { %v1469_v45 = vmax.f32 %v1464_v21, 0.0 }
0x1965   :  { %v1466_v23 = vpop.f32.mrf.mxu1 }
0x1966   :  { %v1470_v24 = vpack.c.bf16 %v1469_v45, %v1469_v45 }
0x1967   :  { %v1850_v25 = vpop.f32.mrf.mxu1 }
0x1968   :  { %1856 = vmatmul.mubr.msk.bf16.vlgmr.msra.gmra.mxu0 %vm225_vm3, %v1470_v24 }
0x1a28   :  { %v1531_v28 = vpop.f32.mrf.mxu0 }
0x1a29   :  { %v1532_v30 = vadd.f32 %v1601_v26, %v1531_v28 }
0x1a2a   :  { %v1857_v29 = vpop.f32.mrf.mxu0 }
0x1a2b   :  { %1538 = vst.msk [vmem:[#allocation10] sm:$0x3] %vm1537_vm5, %v1532_v30 }
0x1a2c   :  { %v1534_v31 = vpop.f32.mrf.mxu0 }
0x1a2d   :  { %2102 = shalt.err (!%p2099_p10)
}
0x1a2e   :  { %1548 = dma.vmem_to_hbm [thread:$0]  %s1546_s8, 32, %s2569_s10, [#allocation4]   ;;  %v1858_v32 = vpop.f32.mrf.mxu0 }
0x1a2f   :  { %2117 = dma.done.wait [#allocation4], 32  }
0x1a30   :  { %2118 = vsyncadd [#allocation4], 4294967264 }
0x1a31   :  { %1552 = vsyncpa [#allocation3], 1 }
0x1a32   :  { %1553 = vsyncpa [#allocation6], 1 }
0x1a33   :  { %1554 = vsyncpa [#allocation9], 1 }
0x1a34   :  { %1555 = vsyncpa [#allocation4], 1 }

</bundles_post_ra>
